<compile_context>
chip_gen: v5e
topology: v5e:2x2
jax: 0.10.0
libtpu: 0.0.40
codegen_flags: <defaults>
</compile_context>

<pallas_src>
import jax
import jax.numpy as jnp
from jax.experimental import pallas as pl
from jax.experimental.pallas import tpu as pltpu

# ---- model config (small, synthetic "bert-base-cased"-shaped encoder) ----
VOCAB = 100
TYPE_VOCAB = 2
MAX_POS = 64
HIDDEN = 32
NUM_HEADS = 4
HEAD_DIM = HIDDEN // NUM_HEADS
FFN = 64
NUM_LAYERS = 2
TAGS = ['PAD', 'B-MISC', 'I-MISC', 'B-PER', 'I-PER', 'B-ORG', 'I-ORG',
        'B-LOC', 'I-LOC', 'O', 'X', 'CLS', 'SEP']
TAG_SIZE = len(TAGS)          # 13
TAG_PAD = 128                 # lane-dense padded tag dimension (sliced to 13 outside)
LN_EPS = 1e-12

# rows of the packed per-layer vector array `vecs` (L, 6, H)
_BO, _B2, _G1, _BE1, _G2, _BE2 = range(6)


# ----------------------------- in-kernel helpers -----------------------------
def _layer_norm(x, g, b):
    mu = jnp.mean(x, axis=-1, keepdims=True)
    var = jnp.mean((x - mu) ** 2, axis=-1, keepdims=True)
    return (x - mu) * jax.lax.rsqrt(var + LN_EPS) * g + b


def _gelu(x):
    # tanh approximation of GELU (maps to the TPU EUP; HF BERT uses the erf form).
    c = 0.7978845608028654
    return 0.5 * x * (1.0 + jnp.tanh(c * (x + 0.044715 * x * x * x)))


# --------------------------------- fused kernel --------------------------------
def _fused_forward_kernel(emb_ref, mb_ref, embln_ref,
                          wqkv_ref, bqkv_ref, wo_ref,
                          w1_ref, b1_ref, w2_ref, vecs_ref,
                          hw_ref, hb_ref, o_ref):
    # One grid step = one batch element; everything below stays resident in
    # vregs/VMEM, no HBM round-trips between layers.
    x = emb_ref[0]                       # (S, H) summed word+pos+type embeddings
    mb = mb_ref[0]                       # (1, S) additive attention-mask bias

    h = _layer_norm(x, embln_ref[0:1, :], embln_ref[1:2, :])

    scale = 1.0 / (HEAD_DIM ** 0.5)
    for l in range(NUM_LAYERS):          # statically unrolled over layers
        # ---- fused QKV projection: one (S,H)x(H,3H) MXU push ----
        qkv = (jnp.dot(h, wqkv_ref[l], preferred_element_type=jnp.float32)
               + bqkv_ref[l])            # (S, 3H)

        bo = vecs_ref[l, _BO:_BO + 1, :]
        b2 = vecs_ref[l, _B2:_B2 + 1, :]
        g1 = vecs_ref[l, _G1:_G1 + 1, :]
        be1 = vecs_ref[l, _BE1:_BE1 + 1, :]
        g2 = vecs_ref[l, _G2:_G2 + 1, :]
        be2 = vecs_ref[l, _BE2:_BE2 + 1, :]

        # ---- multi-head self-attention (heads statically unrolled; head dim is
        #      tiny so the lane slices are cheap and lower robustly) ----
        ctx_parts = []
        for hh in range(NUM_HEADS):
            q_sl = slice(hh * HEAD_DIM, (hh + 1) * HEAD_DIM)
            k_sl = slice(HIDDEN + hh * HEAD_DIM, HIDDEN + (hh + 1) * HEAD_DIM)
            v_sl = slice(2 * HIDDEN + hh * HEAD_DIM, 2 * HIDDEN + (hh + 1) * HEAD_DIM)
            qh, kh, vh = qkv[:, q_sl], qkv[:, k_sl], qkv[:, v_sl]     # (S, hd)
            s = jnp.dot(qh, kh.T, preferred_element_type=jnp.float32) * scale
            s = s + mb
            s = s - jnp.max(s, axis=-1, keepdims=True)
            p = jnp.exp(s)
            # EUP approx reciprocal instead of VALU divide
            p = p * pl.reciprocal(jnp.sum(p, axis=-1, keepdims=True), approx=True)
            ctx_parts.append(jnp.dot(p, vh, preferred_element_type=jnp.float32))
        ctx = jnp.concatenate(ctx_parts, axis=-1)                     # (S, H)

        attn = jnp.dot(ctx, wo_ref[l], preferred_element_type=jnp.float32) + bo
        h1 = _layer_norm(h + attn, g1, be1)

        ff = jnp.dot(h1, w1_ref[l], preferred_element_type=jnp.float32) + b1_ref[l]
        ff = _gelu(ff)
        ff = jnp.dot(ff, w2_ref[l], preferred_element_type=jnp.float32) + b2
        h = _layer_norm(h1 + ff, g2, be2)

    # ---- hidden2tag head, lane-dense (S, 128) output (sliced to 13 outside) ----
    # nn.Dropout(0.2) is identity at inference (eval) time.
    o_ref[0] = (jnp.dot(h, hw_ref[...], preferred_element_type=jnp.float32)
                + hb_ref[...])


# ------------------------------ pallas wrapper -------------------------------
def _full_spec(shape):
    nd = len(shape)
    return pl.BlockSpec(shape, lambda b, _nd=nd: (0,) * _nd)


def fused_forward(emb, mask_bias, p):
    B, S, H = emb.shape
    weights = [p['emb_ln'], p['w_qkv'], p['b_qkv'], p['wo'],
               p['w1'], p['b1'], p['w2'], p['vecs'],
               p['head_w'], p['head_b']]
    in_specs = [pl.BlockSpec((1, S, H), lambda b: (b, 0, 0)),
                pl.BlockSpec((1, 1, S), lambda b: (b, 0, 0))]
    in_specs += [_full_spec(w.shape) for w in weights]
    return pl.pallas_call(
        _fused_forward_kernel,
        grid=(B,),
        in_specs=in_specs,
        out_specs=pl.BlockSpec((1, S, TAG_PAD), lambda b: (b, 0, 0)),
        out_shape=jax.ShapeDtypeStruct((B, S, TAG_PAD), jnp.float32),
        compiler_params=pltpu.CompilerParams(dimension_semantics=("parallel",)),
    )(emb, mask_bias, *weights)


# ----------------------------- params & forward -------------------------------
def init_params(key):
    def nrm(k, shape, scale=0.02):
        return (scale * jax.random.normal(k, shape)).astype(jnp.float32)

    keys = iter(jax.random.split(key, 4 + 4 * NUM_LAYERS))

    word_emb = nrm(next(keys), (VOCAB, HIDDEN))
    pos_emb = nrm(next(keys), (MAX_POS, HIDDEN))
    type_emb = nrm(next(keys), (TYPE_VOCAB, HIDDEN))

    # lane-dense head: pad TAG_SIZE (13) -> 128 lanes; padded columns are zero.
    head_w_core = nrm(next(keys), (HIDDEN, TAG_SIZE))
    head_w = jnp.zeros((HIDDEN, TAG_PAD), jnp.float32).at[:, :TAG_SIZE].set(head_w_core)
    head_b = jnp.zeros((1, TAG_PAD), jnp.float32)

    emb_ln = jnp.concatenate([jnp.ones((1, HIDDEN), jnp.float32),
                              jnp.zeros((1, HIDDEN), jnp.float32)], axis=0)

    w_qkv, wo, w1, w2 = [], [], [], []
    for _ in range(NUM_LAYERS):
        w_qkv.append(nrm(next(keys), (HIDDEN, 3 * HIDDEN)))   # fused Q|K|V
        wo.append(nrm(next(keys), (HIDDEN, HIDDEN)))
        w1.append(nrm(next(keys), (HIDDEN, FFN)))
        w2.append(nrm(next(keys), (FFN, HIDDEN)))

    # packed per-layer vectors: rows = [bo, b2, g1, be1, g2, be2]
    layer_vecs = jnp.stack([jnp.zeros((HIDDEN,)), jnp.zeros((HIDDEN,)),
                            jnp.ones((HIDDEN,)), jnp.zeros((HIDDEN,)),
                            jnp.ones((HIDDEN,)), jnp.zeros((HIDDEN,))], axis=0)
    vecs = jnp.broadcast_to(layer_vecs, (NUM_LAYERS, 6, HIDDEN)).astype(jnp.float32)

    return {
        'word_emb': word_emb,
        'pos_emb': pos_emb,
        'type_emb': type_emb,
        'emb_ln': emb_ln,                              # (2, H): [gamma; beta]
        'w_qkv': jnp.stack(w_qkv, axis=0),             # (L, H, 3H)
        'b_qkv': jnp.zeros((NUM_LAYERS, 1, 3 * HIDDEN), jnp.float32),
        'wo': jnp.stack(wo, axis=0),                   # (L, H, H)
        'w1': jnp.stack(w1, axis=0),                   # (L, H, FFN)
        'b1': jnp.zeros((NUM_LAYERS, 1, FFN), jnp.float32),
        'w2': jnp.stack(w2, axis=0),                   # (L, FFN, H)
        'vecs': vecs,                                  # (L, 6, H)
        'head_w': head_w,                              # (H, 128) lane-dense
        'head_b': head_b,                              # (1, 128)
    }


@jax.jit
def model_forward(params, input_ids, attention_mask, token_type_ids):
    B, S = input_ids.shape
    # Embedding gathers stay in XLA glue; everything downstream is one Pallas call.
    # TODO(synk): optionally fuse the gather via PrefetchScalarGridSpec + pl.Element.
    emb = (params['word_emb'][input_ids]
           + params['pos_emb'][jnp.arange(S)][None, :, :]
           + params['type_emb'][token_type_ids]).astype(jnp.float32)
    mask_bias = ((1.0 - attention_mask.astype(jnp.float32)) * -1e9)[:, None, :]
    logits_padded = fused_forward(emb, mask_bias, params)   # (B, S, 128)
    return logits_padded[..., :TAG_SIZE]                    # (B, S, 13)


if __name__ == "__main__":
    key = jax.random.PRNGKey(0)
    pkey, ikey = jax.random.split(key)
    params = init_params(pkey)

    B, S = 2, 8
    input_ids = jax.random.randint(ikey, (B, S), 0, VOCAB, dtype=jnp.int32)
    attention_mask = jnp.ones((B, S), jnp.int32)
    token_type_ids = jnp.zeros((B, S), jnp.int32)

    logits = model_forward(params, input_ids, attention_mask, token_type_ids)
    jax.block_until_ready(logits)
    assert logits.shape == (B, S, TAG_SIZE) and logits.dtype == jnp.float32
    print("KERNEL_OK")
</pallas_src>

<mosaic_0001>
module attributes {stable_mosaic.version = 11 : i64} {
  func.func @_fused_forward_kernel(%arg0: i32, %arg1: memref<1x8x32xf32, #tpu.memory_space<vmem>>, %arg2: memref<1x1x8xf32, #tpu.memory_space<vmem>>, %arg3: memref<2x32xf32, #tpu.memory_space<vmem>>, %arg4: memref<2x32x96xf32, #tpu.memory_space<vmem>>, %arg5: memref<2x1x96xf32, #tpu.memory_space<vmem>>, %arg6: memref<2x32x32xf32, #tpu.memory_space<vmem>>, %arg7: memref<2x32x64xf32, #tpu.memory_space<vmem>>, %arg8: memref<2x1x64xf32, #tpu.memory_space<vmem>>, %arg9: memref<2x64x32xf32, #tpu.memory_space<vmem>>, %arg10: memref<2x6x32xf32, #tpu.memory_space<vmem>>, %arg11: memref<32x128xf32, #tpu.memory_space<vmem>>, %arg12: memref<1x128xf32, #tpu.memory_space<vmem>>, %arg13: memref<1x8x128xf32, #tpu.memory_space<vmem>>) attributes {dimension_semantics = [#tpu.dimension_semantics<parallel>], iteration_bounds = array<i64: 2>, scalar_prefetch = 0 : i64, scratch_operands = 0 : i64, tpu.core_type = #tpu.core_type<tc>, window_params = [{transform_indices = @transform_0, window_bounds = array<i64: 1, 8, 32>}, {transform_indices = @transform_1, window_bounds = array<i64: 1, 1, 8>}, {pipeline_mode = #tpu.pipeline_mode<synchronous>, transform_indices = @transform_2, window_bounds = array<i64: 2, 32>}, {pipeline_mode = #tpu.pipeline_mode<synchronous>, transform_indices = @transform_3, window_bounds = array<i64: 2, 32, 96>}, {pipeline_mode = #tpu.pipeline_mode<synchronous>, transform_indices = @transform_4, window_bounds = array<i64: 2, 1, 96>}, {pipeline_mode = #tpu.pipeline_mode<synchronous>, transform_indices = @transform_5, window_bounds = array<i64: 2, 32, 32>}, {pipeline_mode = #tpu.pipeline_mode<synchronous>, transform_indices = @transform_6, window_bounds = array<i64: 2, 32, 64>}, {pipeline_mode = #tpu.pipeline_mode<synchronous>, transform_indices = @transform_7, window_bounds = array<i64: 2, 1, 64>}, {pipeline_mode = #tpu.pipeline_mode<synchronous>, transform_indices = @transform_8, window_bounds = array<i64: 2, 64, 32>}, {pipeline_mode = #tpu.pipeline_mode<synchronous>, transform_indices = @transform_9, window_bounds = array<i64: 2, 6, 32>}, {pipeline_mode = #tpu.pipeline_mode<synchronous>, transform_indices = @transform_10, window_bounds = array<i64: 32, 128>}, {pipeline_mode = #tpu.pipeline_mode<synchronous>, transform_indices = @transform_11, window_bounds = array<i64: 1, 128>}, {transform_indices = @transform_12, window_bounds = array<i64: 1, 8, 128>}]} {
    %c0 = arith.constant 0 : index
    %c0_0 = arith.constant 0 : index
    %c0_1 = arith.constant 0 : index
    %0 = vector.load %arg1[%c0, %c0_0, %c0_1] : memref<1x8x32xf32, #tpu.memory_space<vmem>>, vector<1x8x32xf32>
    %1 = vector.shape_cast %0 : vector<1x8x32xf32> to vector<8x32xf32>
    %c0_2 = arith.constant 0 : index
    %c0_3 = arith.constant 0 : index
    %c0_4 = arith.constant 0 : index
    %2 = vector.load %arg2[%c0_2, %c0_3, %c0_4] : memref<1x1x8xf32, #tpu.memory_space<vmem>>, vector<1x1x8xf32>
    %3 = vector.shape_cast %2 : vector<1x1x8xf32> to vector<1x8xf32>
    %c0_5 = arith.constant 0 : index
    %c0_6 = arith.constant 0 : index
    %4 = vector.load %arg3[%c0_5, %c0_6] : memref<2x32xf32, #tpu.memory_space<vmem>>, vector<1x32xf32>
    %c1 = arith.constant 1 : index
    %c0_7 = arith.constant 0 : index
    %5 = vector.load %arg3[%c1, %c0_7] : memref<2x32xf32, #tpu.memory_space<vmem>>, vector<1x32xf32>
    %cst = arith.constant dense<0.000000e+00> : vector<8xf32>
    %6 = vector.multi_reduction <add>, %1, %cst [1] : vector<8x32xf32> to vector<8xf32>
    %7 = vector.shape_cast %6 : vector<8xf32> to vector<8x1xf32>
    %cst_8 = arith.constant 3.200000e+01 : f32
    %8 = vector.broadcast %cst_8 : f32 to vector<8x1xf32>
    %9 = arith.divf %7, %8 : vector<8x1xf32>
    %10 = vector.broadcast %9 : vector<8x1xf32> to vector<8x32xf32>
    %11 = arith.subf %1, %10 : vector<8x32xf32>
    %12 = arith.mulf %11, %11 : vector<8x32xf32>
    %cst_9 = arith.constant dense<0.000000e+00> : vector<8xf32>
    %13 = vector.multi_reduction <add>, %12, %cst_9 [1] : vector<8x32xf32> to vector<8xf32>
    %14 = vector.shape_cast %13 : vector<8xf32> to vector<8x1xf32>
    %cst_10 = arith.constant 3.200000e+01 : f32
    %15 = vector.broadcast %cst_10 : f32 to vector<8x1xf32>
    %16 = arith.divf %14, %15 : vector<8x1xf32>
    %17 = vector.broadcast %9 : vector<8x1xf32> to vector<8x32xf32>
    %18 = arith.subf %1, %17 : vector<8x32xf32>
    %cst_11 = arith.constant 9.99999996E-13 : f32
    %19 = vector.broadcast %cst_11 : f32 to vector<8x1xf32>
    %20 = arith.addf %16, %19 : vector<8x1xf32>
    %21 = math.rsqrt %20 : vector<8x1xf32>
    %22 = vector.broadcast %21 : vector<8x1xf32> to vector<8x32xf32>
    %23 = arith.mulf %18, %22 : vector<8x32xf32>
    %24 = vector.broadcast %4 : vector<1x32xf32> to vector<8x32xf32>
    %25 = arith.mulf %23, %24 : vector<8x32xf32>
    %26 = vector.broadcast %5 : vector<1x32xf32> to vector<8x32xf32>
    %27 = arith.addf %25, %26 : vector<8x32xf32>
    %c0_12 = arith.constant 0 : index
    %c0_13 = arith.constant 0 : index
    %c0_14 = arith.constant 0 : index
    %28 = vector.load %arg4[%c0_12, %c0_13, %c0_14] : memref<2x32x96xf32, #tpu.memory_space<vmem>>, vector<1x32x96xf32>
    %29 = vector.shape_cast %28 : vector<1x32x96xf32> to vector<32x96xf32>
    %cst_15 = arith.constant dense<0.000000e+00> : vector<8x96xf32>
    %30 = tpu.matmul %27, %29, %cst_15 {dimension_numbers = #tpu.dot_dimension_numbers<[1], [0], [0], [1], [0, 0, 1, 1], [], []>} : vector<8x32xf32>, vector<32x96xf32>, vector<8x96xf32> -> vector<8x96xf32>
    %c0_16 = arith.constant 0 : index
    %c0_17 = arith.constant 0 : index
    %c0_18 = arith.constant 0 : index
    %31 = vector.load %arg5[%c0_16, %c0_17, %c0_18] : memref<2x1x96xf32, #tpu.memory_space<vmem>>, vector<1x1x96xf32>
    %32 = vector.shape_cast %31 : vector<1x1x96xf32> to vector<1x96xf32>
    %33 = vector.broadcast %32 : vector<1x96xf32> to vector<8x96xf32>
    %34 = arith.addf %30, %33 : vector<8x96xf32>
    %c0_19 = arith.constant 0 : index
    %c0_20 = arith.constant 0 : index
    %c0_21 = arith.constant 0 : index
    %35 = vector.load %arg10[%c0_19, %c0_20, %c0_21] : memref<2x6x32xf32, #tpu.memory_space<vmem>>, vector<1x1x32xf32>
    %36 = vector.shape_cast %35 : vector<1x1x32xf32> to vector<1x32xf32>
    %c0_22 = arith.constant 0 : index
    %c1_23 = arith.constant 1 : index
    %c0_24 = arith.constant 0 : index
    %37 = vector.load %arg10[%c0_22, %c1_23, %c0_24] : memref<2x6x32xf32, #tpu.memory_space<vmem>>, vector<1x1x32xf32>
    %38 = vector.shape_cast %37 : vector<1x1x32xf32> to vector<1x32xf32>
    %c0_25 = arith.constant 0 : index
    %c2 = arith.constant 2 : index
    %c0_26 = arith.constant 0 : index
    %39 = vector.load %arg10[%c0_25, %c2, %c0_26] : memref<2x6x32xf32, #tpu.memory_space<vmem>>, vector<1x1x32xf32>
    %40 = vector.shape_cast %39 : vector<1x1x32xf32> to vector<1x32xf32>
    %c0_27 = arith.constant 0 : index
    %c3 = arith.constant 3 : index
    %c0_28 = arith.constant 0 : index
    %41 = vector.load %arg10[%c0_27, %c3, %c0_28] : memref<2x6x32xf32, #tpu.memory_space<vmem>>, vector<1x1x32xf32>
    %42 = vector.shape_cast %41 : vector<1x1x32xf32> to vector<1x32xf32>
    %c0_29 = arith.constant 0 : index
    %c4 = arith.constant 4 : index
    %c0_30 = arith.constant 0 : index
    %43 = vector.load %arg10[%c0_29, %c4, %c0_30] : memref<2x6x32xf32, #tpu.memory_space<vmem>>, vector<1x1x32xf32>
    %44 = vector.shape_cast %43 : vector<1x1x32xf32> to vector<1x32xf32>
    %c0_31 = arith.constant 0 : index
    %c5 = arith.constant 5 : index
    %c0_32 = arith.constant 0 : index
    %45 = vector.load %arg10[%c0_31, %c5, %c0_32] : memref<2x6x32xf32, #tpu.memory_space<vmem>>, vector<1x1x32xf32>
    %46 = vector.shape_cast %45 : vector<1x1x32xf32> to vector<1x32xf32>
    %47 = vector.extract_strided_slice %34 {offsets = [0, 0], sizes = [8, 8], strides = [1, 1]} : vector<8x96xf32> to vector<8x8xf32>
    %48 = vector.extract_strided_slice %34 {offsets = [0, 32], sizes = [8, 8], strides = [1, 1]} : vector<8x96xf32> to vector<8x8xf32>
    %49 = vector.extract_strided_slice %34 {offsets = [0, 64], sizes = [8, 8], strides = [1, 1]} : vector<8x96xf32> to vector<8x8xf32>
    %50 = tpu.transpose %48, [1, 0] : vector<8x8xf32> -> vector<8x8xf32>
    %cst_33 = arith.constant dense<0.000000e+00> : vector<8x8xf32>
    %51 = tpu.matmul %47, %50, %cst_33 {dimension_numbers = #tpu.dot_dimension_numbers<[1], [0], [0], [1], [0, 0, 1, 1], [], []>} : vector<8x8xf32>, vector<8x8xf32>, vector<8x8xf32> -> vector<8x8xf32>
    %cst_34 = arith.constant 0.353553385 : f32
    %52 = vector.broadcast %cst_34 : f32 to vector<8x8xf32>
    %53 = arith.mulf %51, %52 : vector<8x8xf32>
    %54 = vector.broadcast %3 : vector<1x8xf32> to vector<8x8xf32>
    %55 = arith.addf %53, %54 : vector<8x8xf32>
    %cst_35 = arith.constant dense<0xFF800000> : vector<8xf32>
    %56 = vector.multi_reduction <maximumf>, %55, %cst_35 [1] : vector<8x8xf32> to vector<8xf32>
    %57 = vector.shape_cast %56 : vector<8xf32> to vector<8x1xf32>
    %58 = vector.broadcast %57 : vector<8x1xf32> to vector<8x8xf32>
    %59 = arith.subf %55, %58 : vector<8x8xf32>
    %60 = math.exp %59 : vector<8x8xf32>
    %cst_36 = arith.constant dense<0.000000e+00> : vector<8xf32>
    %61 = vector.multi_reduction <add>, %60, %cst_36 [1] : vector<8x8xf32> to vector<8xf32>
    %62 = vector.shape_cast %61 : vector<8xf32> to vector<8x1xf32>
    %63 = tpu.reciprocal %62 {approx = true} : vector<8x1xf32> -> vector<8x1xf32>
    %64 = vector.broadcast %63 : vector<8x1xf32> to vector<8x8xf32>
    %65 = arith.mulf %60, %64 : vector<8x8xf32>
    %cst_37 = arith.constant dense<0.000000e+00> : vector<8x8xf32>
    %66 = tpu.matmul %65, %49, %cst_37 {dimension_numbers = #tpu.dot_dimension_numbers<[1], [0], [0], [1], [0, 0, 1, 1], [], []>} : vector<8x8xf32>, vector<8x8xf32>, vector<8x8xf32> -> vector<8x8xf32>
    %67 = vector.extract_strided_slice %34 {offsets = [0, 8], sizes = [8, 8], strides = [1, 1]} : vector<8x96xf32> to vector<8x8xf32>
    %68 = vector.extract_strided_slice %34 {offsets = [0, 40], sizes = [8, 8], strides = [1, 1]} : vector<8x96xf32> to vector<8x8xf32>
    %69 = vector.extract_strided_slice %34 {offsets = [0, 72], sizes = [8, 8], strides = [1, 1]} : vector<8x96xf32> to vector<8x8xf32>
    %70 = tpu.transpose %68, [1, 0] : vector<8x8xf32> -> vector<8x8xf32>
    %cst_38 = arith.constant dense<0.000000e+00> : vector<8x8xf32>
    %71 = tpu.matmul %67, %70, %cst_38 {dimension_numbers = #tpu.dot_dimension_numbers<[1], [0], [0], [1], [0, 0, 1, 1], [], []>} : vector<8x8xf32>, vector<8x8xf32>, vector<8x8xf32> -> vector<8x8xf32>
    %cst_39 = arith.constant 0.353553385 : f32
    %72 = vector.broadcast %cst_39 : f32 to vector<8x8xf32>
    %73 = arith.mulf %71, %72 : vector<8x8xf32>
    %74 = vector.broadcast %3 : vector<1x8xf32> to vector<8x8xf32>
    %75 = arith.addf %73, %74 : vector<8x8xf32>
    %cst_40 = arith.constant dense<0xFF800000> : vector<8xf32>
    %76 = vector.multi_reduction <maximumf>, %75, %cst_40 [1] : vector<8x8xf32> to vector<8xf32>
    %77 = vector.shape_cast %76 : vector<8xf32> to vector<8x1xf32>
    %78 = vector.broadcast %77 : vector<8x1xf32> to vector<8x8xf32>
    %79 = arith.subf %75, %78 : vector<8x8xf32>
    %80 = math.exp %79 : vector<8x8xf32>
    %cst_41 = arith.constant dense<0.000000e+00> : vector<8xf32>
    %81 = vector.multi_reduction <add>, %80, %cst_41 [1] : vector<8x8xf32> to vector<8xf32>
    %82 = vector.shape_cast %81 : vector<8xf32> to vector<8x1xf32>
    %83 = tpu.reciprocal %82 {approx = true} : vector<8x1xf32> -> vector<8x1xf32>
    %84 = vector.broadcast %83 : vector<8x1xf32> to vector<8x8xf32>
    %85 = arith.mulf %80, %84 : vector<8x8xf32>
    %cst_42 = arith.constant dense<0.000000e+00> : vector<8x8xf32>
    %86 = tpu.matmul %85, %69, %cst_42 {dimension_numbers = #tpu.dot_dimension_numbers<[1], [0], [0], [1], [0, 0, 1, 1], [], []>} : vector<8x8xf32>, vector<8x8xf32>, vector<8x8xf32> -> vector<8x8xf32>
    %87 = vector.extract_strided_slice %34 {offsets = [0, 16], sizes = [8, 8], strides = [1, 1]} : vector<8x96xf32> to vector<8x8xf32>
    %88 = vector.extract_strided_slice %34 {offsets = [0, 48], sizes = [8, 8], strides = [1, 1]} : vector<8x96xf32> to vector<8x8xf32>
    %89 = vector.extract_strided_slice %34 {offsets = [0, 80], sizes = [8, 8], strides = [1, 1]} : vector<8x96xf32> to vector<8x8xf32>
    %90 = tpu.transpose %88, [1, 0] : vector<8x8xf32> -> vector<8x8xf32>
    %cst_43 = arith.constant dense<0.000000e+00> : vector<8x8xf32>
    %91 = tpu.matmul %87, %90, %cst_43 {dimension_numbers = #tpu.dot_dimension_numbers<[1], [0], [0], [1], [0, 0, 1, 1], [], []>} : vector<8x8xf32>, vector<8x8xf32>, vector<8x8xf32> -> vector<8x8xf32>
    %cst_44 = arith.constant 0.353553385 : f32
    %92 = vector.broadcast %cst_44 : f32 to vector<8x8xf32>
    %93 = arith.mulf %91, %92 : vector<8x8xf32>
    %94 = vector.broadcast %3 : vector<1x8xf32> to vector<8x8xf32>
    %95 = arith.addf %93, %94 : vector<8x8xf32>
    %cst_45 = arith.constant dense<0xFF800000> : vector<8xf32>
    %96 = vector.multi_reduction <maximumf>, %95, %cst_45 [1] : vector<8x8xf32> to vector<8xf32>
    %97 = vector.shape_cast %96 : vector<8xf32> to vector<8x1xf32>
    %98 = vector.broadcast %97 : vector<8x1xf32> to vector<8x8xf32>
    %99 = arith.subf %95, %98 : vector<8x8xf32>
    %100 = math.exp %99 : vector<8x8xf32>
    %cst_46 = arith.constant dense<0.000000e+00> : vector<8xf32>
    %101 = vector.multi_reduction <add>, %100, %cst_46 [1] : vector<8x8xf32> to vector<8xf32>
    %102 = vector.shape_cast %101 : vector<8xf32> to vector<8x1xf32>
    %103 = tpu.reciprocal %102 {approx = true} : vector<8x1xf32> -> vector<8x1xf32>
    %104 = vector.broadcast %103 : vector<8x1xf32> to vector<8x8xf32>
    %105 = arith.mulf %100, %104 : vector<8x8xf32>
    %cst_47 = arith.constant dense<0.000000e+00> : vector<8x8xf32>
    %106 = tpu.matmul %105, %89, %cst_47 {dimension_numbers = #tpu.dot_dimension_numbers<[1], [0], [0], [1], [0, 0, 1, 1], [], []>} : vector<8x8xf32>, vector<8x8xf32>, vector<8x8xf32> -> vector<8x8xf32>
    %107 = vector.extract_strided_slice %34 {offsets = [0, 24], sizes = [8, 8], strides = [1, 1]} : vector<8x96xf32> to vector<8x8xf32>
    %108 = vector.extract_strided_slice %34 {offsets = [0, 56], sizes = [8, 8], strides = [1, 1]} : vector<8x96xf32> to vector<8x8xf32>
    %109 = vector.extract_strided_slice %34 {offsets = [0, 88], sizes = [8, 8], strides = [1, 1]} : vector<8x96xf32> to vector<8x8xf32>
    %110 = tpu.transpose %108, [1, 0] : vector<8x8xf32> -> vector<8x8xf32>
    %cst_48 = arith.constant dense<0.000000e+00> : vector<8x8xf32>
    %111 = tpu.matmul %107, %110, %cst_48 {dimension_numbers = #tpu.dot_dimension_numbers<[1], [0], [0], [1], [0, 0, 1, 1], [], []>} : vector<8x8xf32>, vector<8x8xf32>, vector<8x8xf32> -> vector<8x8xf32>
    %cst_49 = arith.constant 0.353553385 : f32
    %112 = vector.broadcast %cst_49 : f32 to vector<8x8xf32>
    %113 = arith.mulf %111, %112 : vector<8x8xf32>
    %114 = vector.broadcast %3 : vector<1x8xf32> to vector<8x8xf32>
    %115 = arith.addf %113, %114 : vector<8x8xf32>
    %cst_50 = arith.constant dense<0xFF800000> : vector<8xf32>
    %116 = vector.multi_reduction <maximumf>, %115, %cst_50 [1] : vector<8x8xf32> to vector<8xf32>
    %117 = vector.shape_cast %116 : vector<8xf32> to vector<8x1xf32>
    %118 = vector.broadcast %117 : vector<8x1xf32> to vector<8x8xf32>
    %119 = arith.subf %115, %118 : vector<8x8xf32>
    %120 = math.exp %119 : vector<8x8xf32>
    %cst_51 = arith.constant dense<0.000000e+00> : vector<8xf32>
    %121 = vector.multi_reduction <add>, %120, %cst_51 [1] : vector<8x8xf32> to vector<8xf32>
    %122 = vector.shape_cast %121 : vector<8xf32> to vector<8x1xf32>
    %123 = tpu.reciprocal %122 {approx = true} : vector<8x1xf32> -> vector<8x1xf32>
    %124 = vector.broadcast %123 : vector<8x1xf32> to vector<8x8xf32>
    %125 = arith.mulf %120, %124 : vector<8x8xf32>
    %cst_52 = arith.constant dense<0.000000e+00> : vector<8x8xf32>
    %126 = tpu.matmul %125, %109, %cst_52 {dimension_numbers = #tpu.dot_dimension_numbers<[1], [0], [0], [1], [0, 0, 1, 1], [], []>} : vector<8x8xf32>, vector<8x8xf32>, vector<8x8xf32> -> vector<8x8xf32>
    %127 = tpu.concatenate %66, %86, %106, %126 in 1 : vector<8x8xf32>, vector<8x8xf32>, vector<8x8xf32>, vector<8x8xf32> -> vector<8x32xf32>
    %c0_53 = arith.constant 0 : index
    %c0_54 = arith.constant 0 : index
    %c0_55 = arith.constant 0 : index
    %128 = vector.load %arg6[%c0_53, %c0_54, %c0_55] : memref<2x32x32xf32, #tpu.memory_space<vmem>>, vector<1x32x32xf32>
    %129 = vector.shape_cast %128 : vector<1x32x32xf32> to vector<32x32xf32>
    %cst_56 = arith.constant dense<0.000000e+00> : vector<8x32xf32>
    %130 = tpu.matmul %127, %129, %cst_56 {dimension_numbers = #tpu.dot_dimension_numbers<[1], [0], [0], [1], [0, 0, 1, 1], [], []>} : vector<8x32xf32>, vector<32x32xf32>, vector<8x32xf32> -> vector<8x32xf32>
    %131 = vector.broadcast %36 : vector<1x32xf32> to vector<8x32xf32>
    %132 = arith.addf %130, %131 : vector<8x32xf32>
    %133 = arith.addf %27, %132 : vector<8x32xf32>
    %cst_57 = arith.constant dense<0.000000e+00> : vector<8xf32>
    %134 = vector.multi_reduction <add>, %133, %cst_57 [1] : vector<8x32xf32> to vector<8xf32>
    %135 = vector.shape_cast %134 : vector<8xf32> to vector<8x1xf32>
    %cst_58 = arith.constant 3.200000e+01 : f32
    %136 = vector.broadcast %cst_58 : f32 to vector<8x1xf32>
    %137 = arith.divf %135, %136 : vector<8x1xf32>
    %138 = vector.broadcast %137 : vector<8x1xf32> to vector<8x32xf32>
    %139 = arith.subf %133, %138 : vector<8x32xf32>
    %140 = arith.mulf %139, %139 : vector<8x32xf32>
    %cst_59 = arith.constant dense<0.000000e+00> : vector<8xf32>
    %141 = vector.multi_reduction <add>, %140, %cst_59 [1] : vector<8x32xf32> to vector<8xf32>
    %142 = vector.shape_cast %141 : vector<8xf32> to vector<8x1xf32>
    %cst_60 = arith.constant 3.200000e+01 : f32
    %143 = vector.broadcast %cst_60 : f32 to vector<8x1xf32>
    %144 = arith.divf %142, %143 : vector<8x1xf32>
    %145 = vector.broadcast %137 : vector<8x1xf32> to vector<8x32xf32>
    %146 = arith.subf %133, %145 : vector<8x32xf32>
    %cst_61 = arith.constant 9.99999996E-13 : f32
    %147 = vector.broadcast %cst_61 : f32 to vector<8x1xf32>
    %148 = arith.addf %144, %147 : vector<8x1xf32>
    %149 = math.rsqrt %148 : vector<8x1xf32>
    %150 = vector.broadcast %149 : vector<8x1xf32> to vector<8x32xf32>
    %151 = arith.mulf %146, %150 : vector<8x32xf32>
    %152 = vector.broadcast %40 : vector<1x32xf32> to vector<8x32xf32>
    %153 = arith.mulf %151, %152 : vector<8x32xf32>
    %154 = vector.broadcast %42 : vector<1x32xf32> to vector<8x32xf32>
    %155 = arith.addf %153, %154 : vector<8x32xf32>
    %c0_62 = arith.constant 0 : index
    %c0_63 = arith.constant 0 : index
    %c0_64 = arith.constant 0 : index
    %156 = vector.load %arg7[%c0_62, %c0_63, %c0_64] : memref<2x32x64xf32, #tpu.memory_space<vmem>>, vector<1x32x64xf32>
    %157 = vector.shape_cast %156 : vector<1x32x64xf32> to vector<32x64xf32>
    %cst_65 = arith.constant dense<0.000000e+00> : vector<8x64xf32>
    %158 = tpu.matmul %155, %157, %cst_65 {dimension_numbers = #tpu.dot_dimension_numbers<[1], [0], [0], [1], [0, 0, 1, 1], [], []>} : vector<8x32xf32>, vector<32x64xf32>, vector<8x64xf32> -> vector<8x64xf32>
    %c0_66 = arith.constant 0 : index
    %c0_67 = arith.constant 0 : index
    %c0_68 = arith.constant 0 : index
    %159 = vector.load %arg8[%c0_66, %c0_67, %c0_68] : memref<2x1x64xf32, #tpu.memory_space<vmem>>, vector<1x1x64xf32>
    %160 = vector.shape_cast %159 : vector<1x1x64xf32> to vector<1x64xf32>
    %161 = vector.broadcast %160 : vector<1x64xf32> to vector<8x64xf32>
    %162 = arith.addf %158, %161 : vector<8x64xf32>
    %cst_69 = arith.constant 5.000000e-01 : f32
    %163 = vector.broadcast %cst_69 : f32 to vector<8x64xf32>
    %164 = arith.mulf %163, %162 : vector<8x64xf32>
    %cst_70 = arith.constant 4.471500e-02 : f32
    %165 = vector.broadcast %cst_70 : f32 to vector<8x64xf32>
    %166 = arith.mulf %165, %162 : vector<8x64xf32>
    %167 = arith.mulf %166, %162 : vector<8x64xf32>
    %168 = arith.mulf %167, %162 : vector<8x64xf32>
    %169 = arith.addf %162, %168 : vector<8x64xf32>
    %cst_71 = arith.constant 0.797884583 : f32
    %170 = vector.broadcast %cst_71 : f32 to vector<8x64xf32>
    %171 = arith.mulf %170, %169 : vector<8x64xf32>
    %172 = math.tanh %171 : vector<8x64xf32>
    %cst_72 = arith.constant 1.000000e+00 : f32
    %173 = vector.broadcast %cst_72 : f32 to vector<8x64xf32>
    %174 = arith.addf %173, %172 : vector<8x64xf32>
    %175 = arith.mulf %164, %174 : vector<8x64xf32>
    %c0_73 = arith.constant 0 : index
    %c0_74 = arith.constant 0 : index
    %c0_75 = arith.constant 0 : index
    %176 = vector.load %arg9[%c0_73, %c0_74, %c0_75] : memref<2x64x32xf32, #tpu.memory_space<vmem>>, vector<1x64x32xf32>
    %177 = vector.shape_cast %176 : vector<1x64x32xf32> to vector<64x32xf32>
    %cst_76 = arith.constant dense<0.000000e+00> : vector<8x32xf32>
    %178 = tpu.matmul %175, %177, %cst_76 {dimension_numbers = #tpu.dot_dimension_numbers<[1], [0], [0], [1], [0, 0, 1, 1], [], []>} : vector<8x64xf32>, vector<64x32xf32>, vector<8x32xf32> -> vector<8x32xf32>
    %179 = vector.broadcast %38 : vector<1x32xf32> to vector<8x32xf32>
    %180 = arith.addf %178, %179 : vector<8x32xf32>
    %181 = arith.addf %155, %180 : vector<8x32xf32>
    %cst_77 = arith.constant dense<0.000000e+00> : vector<8xf32>
    %182 = vector.multi_reduction <add>, %181, %cst_77 [1] : vector<8x32xf32> to vector<8xf32>
    %183 = vector.shape_cast %182 : vector<8xf32> to vector<8x1xf32>
    %cst_78 = arith.constant 3.200000e+01 : f32
    %184 = vector.broadcast %cst_78 : f32 to vector<8x1xf32>
    %185 = arith.divf %183, %184 : vector<8x1xf32>
    %186 = vector.broadcast %185 : vector<8x1xf32> to vector<8x32xf32>
    %187 = arith.subf %181, %186 : vector<8x32xf32>
    %188 = arith.mulf %187, %187 : vector<8x32xf32>
    %cst_79 = arith.constant dense<0.000000e+00> : vector<8xf32>
    %189 = vector.multi_reduction <add>, %188, %cst_79 [1] : vector<8x32xf32> to vector<8xf32>
    %190 = vector.shape_cast %189 : vector<8xf32> to vector<8x1xf32>
    %cst_80 = arith.constant 3.200000e+01 : f32
    %191 = vector.broadcast %cst_80 : f32 to vector<8x1xf32>
    %192 = arith.divf %190, %191 : vector<8x1xf32>
    %193 = vector.broadcast %185 : vector<8x1xf32> to vector<8x32xf32>
    %194 = arith.subf %181, %193 : vector<8x32xf32>
    %cst_81 = arith.constant 9.99999996E-13 : f32
    %195 = vector.broadcast %cst_81 : f32 to vector<8x1xf32>
    %196 = arith.addf %192, %195 : vector<8x1xf32>
    %197 = math.rsqrt %196 : vector<8x1xf32>
    %198 = vector.broadcast %197 : vector<8x1xf32> to vector<8x32xf32>
    %199 = arith.mulf %194, %198 : vector<8x32xf32>
    %200 = vector.broadcast %44 : vector<1x32xf32> to vector<8x32xf32>
    %201 = arith.mulf %199, %200 : vector<8x32xf32>
    %202 = vector.broadcast %46 : vector<1x32xf32> to vector<8x32xf32>
    %203 = arith.addf %201, %202 : vector<8x32xf32>
    %c1_82 = arith.constant 1 : index
    %c0_83 = arith.constant 0 : index
    %c0_84 = arith.constant 0 : index
    %204 = vector.load %arg4[%c1_82, %c0_83, %c0_84] : memref<2x32x96xf32, #tpu.memory_space<vmem>>, vector<1x32x96xf32>
    %205 = vector.shape_cast %204 : vector<1x32x96xf32> to vector<32x96xf32>
    %cst_85 = arith.constant dense<0.000000e+00> : vector<8x96xf32>
    %206 = tpu.matmul %203, %205, %cst_85 {dimension_numbers = #tpu.dot_dimension_numbers<[1], [0], [0], [1], [0, 0, 1, 1], [], []>} : vector<8x32xf32>, vector<32x96xf32>, vector<8x96xf32> -> vector<8x96xf32>
    %c1_86 = arith.constant 1 : index
    %c0_87 = arith.constant 0 : index
    %c0_88 = arith.constant 0 : index
    %207 = vector.load %arg5[%c1_86, %c0_87, %c0_88] : memref<2x1x96xf32, #tpu.memory_space<vmem>>, vector<1x1x96xf32>
    %208 = vector.shape_cast %207 : vector<1x1x96xf32> to vector<1x96xf32>
    %209 = vector.broadcast %208 : vector<1x96xf32> to vector<8x96xf32>
    %210 = arith.addf %206, %209 : vector<8x96xf32>
    %c1_89 = arith.constant 1 : index
    %c0_90 = arith.constant 0 : index
    %c0_91 = arith.constant 0 : index
    %211 = vector.load %arg10[%c1_89, %c0_90, %c0_91] : memref<2x6x32xf32, #tpu.memory_space<vmem>>, vector<1x1x32xf32>
    %212 = vector.shape_cast %211 : vector<1x1x32xf32> to vector<1x32xf32>
    %c1_92 = arith.constant 1 : index
    %c1_93 = arith.constant 1 : index
    %c0_94 = arith.constant 0 : index
    %213 = vector.load %arg10[%c1_92, %c1_93, %c0_94] : memref<2x6x32xf32, #tpu.memory_space<vmem>>, vector<1x1x32xf32>
    %214 = vector.shape_cast %213 : vector<1x1x32xf32> to vector<1x32xf32>
    %c1_95 = arith.constant 1 : index
    %c2_96 = arith.constant 2 : index
    %c0_97 = arith.constant 0 : index
    %215 = vector.load %arg10[%c1_95, %c2_96, %c0_97] : memref<2x6x32xf32, #tpu.memory_space<vmem>>, vector<1x1x32xf32>
    %216 = vector.shape_cast %215 : vector<1x1x32xf32> to vector<1x32xf32>
    %c1_98 = arith.constant 1 : index
    %c3_99 = arith.constant 3 : index
    %c0_100 = arith.constant 0 : index
    %217 = vector.load %arg10[%c1_98, %c3_99, %c0_100] : memref<2x6x32xf32, #tpu.memory_space<vmem>>, vector<1x1x32xf32>
    %218 = vector.shape_cast %217 : vector<1x1x32xf32> to vector<1x32xf32>
    %c1_101 = arith.constant 1 : index
    %c4_102 = arith.constant 4 : index
    %c0_103 = arith.constant 0 : index
    %219 = vector.load %arg10[%c1_101, %c4_102, %c0_103] : memref<2x6x32xf32, #tpu.memory_space<vmem>>, vector<1x1x32xf32>
    %220 = vector.shape_cast %219 : vector<1x1x32xf32> to vector<1x32xf32>
    %c1_104 = arith.constant 1 : index
    %c5_105 = arith.constant 5 : index
    %c0_106 = arith.constant 0 : index
    %221 = vector.load %arg10[%c1_104, %c5_105, %c0_106] : memref<2x6x32xf32, #tpu.memory_space<vmem>>, vector<1x1x32xf32>
    %222 = vector.shape_cast %221 : vector<1x1x32xf32> to vector<1x32xf32>
    %223 = vector.extract_strided_slice %210 {offsets = [0, 0], sizes = [8, 8], strides = [1, 1]} : vector<8x96xf32> to vector<8x8xf32>
    %224 = vector.extract_strided_slice %210 {offsets = [0, 32], sizes = [8, 8], strides = [1, 1]} : vector<8x96xf32> to vector<8x8xf32>
    %225 = vector.extract_strided_slice %210 {offsets = [0, 64], sizes = [8, 8], strides = [1, 1]} : vector<8x96xf32> to vector<8x8xf32>
    %226 = tpu.transpose %224, [1, 0] : vector<8x8xf32> -> vector<8x8xf32>
    %cst_107 = arith.constant dense<0.000000e+00> : vector<8x8xf32>
    %227 = tpu.matmul %223, %226, %cst_107 {dimension_numbers = #tpu.dot_dimension_numbers<[1], [0], [0], [1], [0, 0, 1, 1], [], []>} : vector<8x8xf32>, vector<8x8xf32>, vector<8x8xf32> -> vector<8x8xf32>
    %cst_108 = arith.constant 0.353553385 : f32
    %228 = vector.broadcast %cst_108 : f32 to vector<8x8xf32>
    %229 = arith.mulf %227, %228 : vector<8x8xf32>
    %230 = vector.broadcast %3 : vector<1x8xf32> to vector<8x8xf32>
    %231 = arith.addf %229, %230 : vector<8x8xf32>
    %cst_109 = arith.constant dense<0xFF800000> : vector<8xf32>
    %232 = vector.multi_reduction <maximumf>, %231, %cst_109 [1] : vector<8x8xf32> to vector<8xf32>
    %233 = vector.shape_cast %232 : vector<8xf32> to vector<8x1xf32>
    %234 = vector.broadcast %233 : vector<8x1xf32> to vector<8x8xf32>
    %235 = arith.subf %231, %234 : vector<8x8xf32>
    %236 = math.exp %235 : vector<8x8xf32>
    %cst_110 = arith.constant dense<0.000000e+00> : vector<8xf32>
    %237 = vector.multi_reduction <add>, %236, %cst_110 [1] : vector<8x8xf32> to vector<8xf32>
    %238 = vector.shape_cast %237 : vector<8xf32> to vector<8x1xf32>
    %239 = tpu.reciprocal %238 {approx = true} : vector<8x1xf32> -> vector<8x1xf32>
    %240 = vector.broadcast %239 : vector<8x1xf32> to vector<8x8xf32>
    %241 = arith.mulf %236, %240 : vector<8x8xf32>
    %cst_111 = arith.constant dense<0.000000e+00> : vector<8x8xf32>
    %242 = tpu.matmul %241, %225, %cst_111 {dimension_numbers = #tpu.dot_dimension_numbers<[1], [0], [0], [1], [0, 0, 1, 1], [], []>} : vector<8x8xf32>, vector<8x8xf32>, vector<8x8xf32> -> vector<8x8xf32>
    %243 = vector.extract_strided_slice %210 {offsets = [0, 8], sizes = [8, 8], strides = [1, 1]} : vector<8x96xf32> to vector<8x8xf32>
    %244 = vector.extract_strided_slice %210 {offsets = [0, 40], sizes = [8, 8], strides = [1, 1]} : vector<8x96xf32> to vector<8x8xf32>
    %245 = vector.extract_strided_slice %210 {offsets = [0, 72], sizes = [8, 8], strides = [1, 1]} : vector<8x96xf32> to vector<8x8xf32>
    %246 = tpu.transpose %244, [1, 0] : vector<8x8xf32> -> vector<8x8xf32>
    %cst_112 = arith.constant dense<0.000000e+00> : vector<8x8xf32>
    %247 = tpu.matmul %243, %246, %cst_112 {dimension_numbers = #tpu.dot_dimension_numbers<[1], [0], [0], [1], [0, 0, 1, 1], [], []>} : vector<8x8xf32>, vector<8x8xf32>, vector<8x8xf32> -> vector<8x8xf32>
    %cst_113 = arith.constant 0.353553385 : f32
    %248 = vector.broadcast %cst_113 : f32 to vector<8x8xf32>
    %249 = arith.mulf %247, %248 : vector<8x8xf32>
    %250 = vector.broadcast %3 : vector<1x8xf32> to vector<8x8xf32>
    %251 = arith.addf %249, %250 : vector<8x8xf32>
    %cst_114 = arith.constant dense<0xFF800000> : vector<8xf32>
    %252 = vector.multi_reduction <maximumf>, %251, %cst_114 [1] : vector<8x8xf32> to vector<8xf32>
    %253 = vector.shape_cast %252 : vector<8xf32> to vector<8x1xf32>
    %254 = vector.broadcast %253 : vector<8x1xf32> to vector<8x8xf32>
    %255 = arith.subf %251, %254 : vector<8x8xf32>
    %256 = math.exp %255 : vector<8x8xf32>
    %cst_115 = arith.constant dense<0.000000e+00> : vector<8xf32>
    %257 = vector.multi_reduction <add>, %256, %cst_115 [1] : vector<8x8xf32> to vector<8xf32>
    %258 = vector.shape_cast %257 : vector<8xf32> to vector<8x1xf32>
    %259 = tpu.reciprocal %258 {approx = true} : vector<8x1xf32> -> vector<8x1xf32>
    %260 = vector.broadcast %259 : vector<8x1xf32> to vector<8x8xf32>
    %261 = arith.mulf %256, %260 : vector<8x8xf32>
    %cst_116 = arith.constant dense<0.000000e+00> : vector<8x8xf32>
    %262 = tpu.matmul %261, %245, %cst_116 {dimension_numbers = #tpu.dot_dimension_numbers<[1], [0], [0], [1], [0, 0, 1, 1], [], []>} : vector<8x8xf32>, vector<8x8xf32>, vector<8x8xf32> -> vector<8x8xf32>
    %263 = vector.extract_strided_slice %210 {offsets = [0, 16], sizes = [8, 8], strides = [1, 1]} : vector<8x96xf32> to vector<8x8xf32>
    %264 = vector.extract_strided_slice %210 {offsets = [0, 48], sizes = [8, 8], strides = [1, 1]} : vector<8x96xf32> to vector<8x8xf32>
    %265 = vector.extract_strided_slice %210 {offsets = [0, 80], sizes = [8, 8], strides = [1, 1]} : vector<8x96xf32> to vector<8x8xf32>
    %266 = tpu.transpose %264, [1, 0] : vector<8x8xf32> -> vector<8x8xf32>
    %cst_117 = arith.constant dense<0.000000e+00> : vector<8x8xf32>
    %267 = tpu.matmul %263, %266, %cst_117 {dimension_numbers = #tpu.dot_dimension_numbers<[1], [0], [0], [1], [0, 0, 1, 1], [], []>} : vector<8x8xf32>, vector<8x8xf32>, vector<8x8xf32> -> vector<8x8xf32>
    %cst_118 = arith.constant 0.353553385 : f32
    %268 = vector.broadcast %cst_118 : f32 to vector<8x8xf32>
    %269 = arith.mulf %267, %268 : vector<8x8xf32>
    %270 = vector.broadcast %3 : vector<1x8xf32> to vector<8x8xf32>
    %271 = arith.addf %269, %270 : vector<8x8xf32>
    %cst_119 = arith.constant dense<0xFF800000> : vector<8xf32>
    %272 = vector.multi_reduction <maximumf>, %271, %cst_119 [1] : vector<8x8xf32> to vector<8xf32>
    %273 = vector.shape_cast %272 : vector<8xf32> to vector<8x1xf32>
    %274 = vector.broadcast %273 : vector<8x1xf32> to vector<8x8xf32>
    %275 = arith.subf %271, %274 : vector<8x8xf32>
    %276 = math.exp %275 : vector<8x8xf32>
    %cst_120 = arith.constant dense<0.000000e+00> : vector<8xf32>
    %277 = vector.multi_reduction <add>, %276, %cst_120 [1] : vector<8x8xf32> to vector<8xf32>
    %278 = vector.shape_cast %277 : vector<8xf32> to vector<8x1xf32>
    %279 = tpu.reciprocal %278 {approx = true} : vector<8x1xf32> -> vector<8x1xf32>
    %280 = vector.broadcast %279 : vector<8x1xf32> to vector<8x8xf32>
    %281 = arith.mulf %276, %280 : vector<8x8xf32>
    %cst_121 = arith.constant dense<0.000000e+00> : vector<8x8xf32>
    %282 = tpu.matmul %281, %265, %cst_121 {dimension_numbers = #tpu.dot_dimension_numbers<[1], [0], [0], [1], [0, 0, 1, 1], [], []>} : vector<8x8xf32>, vector<8x8xf32>, vector<8x8xf32> -> vector<8x8xf32>
    %283 = vector.extract_strided_slice %210 {offsets = [0, 24], sizes = [8, 8], strides = [1, 1]} : vector<8x96xf32> to vector<8x8xf32>
    %284 = vector.extract_strided_slice %210 {offsets = [0, 56], sizes = [8, 8], strides = [1, 1]} : vector<8x96xf32> to vector<8x8xf32>
    %285 = vector.extract_strided_slice %210 {offsets = [0, 88], sizes = [8, 8], strides = [1, 1]} : vector<8x96xf32> to vector<8x8xf32>
    %286 = tpu.transpose %284, [1, 0] : vector<8x8xf32> -> vector<8x8xf32>
    %cst_122 = arith.constant dense<0.000000e+00> : vector<8x8xf32>
    %287 = tpu.matmul %283, %286, %cst_122 {dimension_numbers = #tpu.dot_dimension_numbers<[1], [0], [0], [1], [0, 0, 1, 1], [], []>} : vector<8x8xf32>, vector<8x8xf32>, vector<8x8xf32> -> vector<8x8xf32>
    %cst_123 = arith.constant 0.353553385 : f32
    %288 = vector.broadcast %cst_123 : f32 to vector<8x8xf32>
    %289 = arith.mulf %287, %288 : vector<8x8xf32>
    %290 = vector.broadcast %3 : vector<1x8xf32> to vector<8x8xf32>
    %291 = arith.addf %289, %290 : vector<8x8xf32>
    %cst_124 = arith.constant dense<0xFF800000> : vector<8xf32>
    %292 = vector.multi_reduction <maximumf>, %291, %cst_124 [1] : vector<8x8xf32> to vector<8xf32>
    %293 = vector.shape_cast %292 : vector<8xf32> to vector<8x1xf32>
    %294 = vector.broadcast %293 : vector<8x1xf32> to vector<8x8xf32>
    %295 = arith.subf %291, %294 : vector<8x8xf32>
    %296 = math.exp %295 : vector<8x8xf32>
    %cst_125 = arith.constant dense<0.000000e+00> : vector<8xf32>
    %297 = vector.multi_reduction <add>, %296, %cst_125 [1] : vector<8x8xf32> to vector<8xf32>
    %298 = vector.shape_cast %297 : vector<8xf32> to vector<8x1xf32>
    %299 = tpu.reciprocal %298 {approx = true} : vector<8x1xf32> -> vector<8x1xf32>
    %300 = vector.broadcast %299 : vector<8x1xf32> to vector<8x8xf32>
    %301 = arith.mulf %296, %300 : vector<8x8xf32>
    %cst_126 = arith.constant dense<0.000000e+00> : vector<8x8xf32>
    %302 = tpu.matmul %301, %285, %cst_126 {dimension_numbers = #tpu.dot_dimension_numbers<[1], [0], [0], [1], [0, 0, 1, 1], [], []>} : vector<8x8xf32>, vector<8x8xf32>, vector<8x8xf32> -> vector<8x8xf32>
    %303 = tpu.concatenate %242, %262, %282, %302 in 1 : vector<8x8xf32>, vector<8x8xf32>, vector<8x8xf32>, vector<8x8xf32> -> vector<8x32xf32>
    %c1_127 = arith.constant 1 : index
    %c0_128 = arith.constant 0 : index
    %c0_129 = arith.constant 0 : index
    %304 = vector.load %arg6[%c1_127, %c0_128, %c0_129] : memref<2x32x32xf32, #tpu.memory_space<vmem>>, vector<1x32x32xf32>
    %305 = vector.shape_cast %304 : vector<1x32x32xf32> to vector<32x32xf32>
    %cst_130 = arith.constant dense<0.000000e+00> : vector<8x32xf32>
    %306 = tpu.matmul %303, %305, %cst_130 {dimension_numbers = #tpu.dot_dimension_numbers<[1], [0], [0], [1], [0, 0, 1, 1], [], []>} : vector<8x32xf32>, vector<32x32xf32>, vector<8x32xf32> -> vector<8x32xf32>
    %307 = vector.broadcast %212 : vector<1x32xf32> to vector<8x32xf32>
    %308 = arith.addf %306, %307 : vector<8x32xf32>
    %309 = arith.addf %203, %308 : vector<8x32xf32>
    %cst_131 = arith.constant dense<0.000000e+00> : vector<8xf32>
    %310 = vector.multi_reduction <add>, %309, %cst_131 [1] : vector<8x32xf32> to vector<8xf32>
    %311 = vector.shape_cast %310 : vector<8xf32> to vector<8x1xf32>
    %cst_132 = arith.constant 3.200000e+01 : f32
    %312 = vector.broadcast %cst_132 : f32 to vector<8x1xf32>
    %313 = arith.divf %311, %312 : vector<8x1xf32>
    %314 = vector.broadcast %313 : vector<8x1xf32> to vector<8x32xf32>
    %315 = arith.subf %309, %314 : vector<8x32xf32>
    %316 = arith.mulf %315, %315 : vector<8x32xf32>
    %cst_133 = arith.constant dense<0.000000e+00> : vector<8xf32>
    %317 = vector.multi_reduction <add>, %316, %cst_133 [1] : vector<8x32xf32> to vector<8xf32>
    %318 = vector.shape_cast %317 : vector<8xf32> to vector<8x1xf32>
    %cst_134 = arith.constant 3.200000e+01 : f32
    %319 = vector.broadcast %cst_134 : f32 to vector<8x1xf32>
    %320 = arith.divf %318, %319 : vector<8x1xf32>
    %321 = vector.broadcast %313 : vector<8x1xf32> to vector<8x32xf32>
    %322 = arith.subf %309, %321 : vector<8x32xf32>
    %cst_135 = arith.constant 9.99999996E-13 : f32
    %323 = vector.broadcast %cst_135 : f32 to vector<8x1xf32>
    %324 = arith.addf %320, %323 : vector<8x1xf32>
    %325 = math.rsqrt %324 : vector<8x1xf32>
    %326 = vector.broadcast %325 : vector<8x1xf32> to vector<8x32xf32>
    %327 = arith.mulf %322, %326 : vector<8x32xf32>
    %328 = vector.broadcast %216 : vector<1x32xf32> to vector<8x32xf32>
    %329 = arith.mulf %327, %328 : vector<8x32xf32>
    %330 = vector.broadcast %218 : vector<1x32xf32> to vector<8x32xf32>
    %331 = arith.addf %329, %330 : vector<8x32xf32>
    %c1_136 = arith.constant 1 : index
    %c0_137 = arith.constant 0 : index
    %c0_138 = arith.constant 0 : index
    %332 = vector.load %arg7[%c1_136, %c0_137, %c0_138] : memref<2x32x64xf32, #tpu.memory_space<vmem>>, vector<1x32x64xf32>
    %333 = vector.shape_cast %332 : vector<1x32x64xf32> to vector<32x64xf32>
    %cst_139 = arith.constant dense<0.000000e+00> : vector<8x64xf32>
    %334 = tpu.matmul %331, %333, %cst_139 {dimension_numbers = #tpu.dot_dimension_numbers<[1], [0], [0], [1], [0, 0, 1, 1], [], []>} : vector<8x32xf32>, vector<32x64xf32>, vector<8x64xf32> -> vector<8x64xf32>
    %c1_140 = arith.constant 1 : index
    %c0_141 = arith.constant 0 : index
    %c0_142 = arith.constant 0 : index
    %335 = vector.load %arg8[%c1_140, %c0_141, %c0_142] : memref<2x1x64xf32, #tpu.memory_space<vmem>>, vector<1x1x64xf32>
    %336 = vector.shape_cast %335 : vector<1x1x64xf32> to vector<1x64xf32>
    %337 = vector.broadcast %336 : vector<1x64xf32> to vector<8x64xf32>
    %338 = arith.addf %334, %337 : vector<8x64xf32>
    %cst_143 = arith.constant 5.000000e-01 : f32
    %339 = vector.broadcast %cst_143 : f32 to vector<8x64xf32>
    %340 = arith.mulf %339, %338 : vector<8x64xf32>
    %cst_144 = arith.constant 4.471500e-02 : f32
    %341 = vector.broadcast %cst_144 : f32 to vector<8x64xf32>
    %342 = arith.mulf %341, %338 : vector<8x64xf32>
    %343 = arith.mulf %342, %338 : vector<8x64xf32>
    %344 = arith.mulf %343, %338 : vector<8x64xf32>
    %345 = arith.addf %338, %344 : vector<8x64xf32>
    %cst_145 = arith.constant 0.797884583 : f32
    %346 = vector.broadcast %cst_145 : f32 to vector<8x64xf32>
    %347 = arith.mulf %346, %345 : vector<8x64xf32>
    %348 = math.tanh %347 : vector<8x64xf32>
    %cst_146 = arith.constant 1.000000e+00 : f32
    %349 = vector.broadcast %cst_146 : f32 to vector<8x64xf32>
    %350 = arith.addf %349, %348 : vector<8x64xf32>
    %351 = arith.mulf %340, %350 : vector<8x64xf32>
    %c1_147 = arith.constant 1 : index
    %c0_148 = arith.constant 0 : index
    %c0_149 = arith.constant 0 : index
    %352 = vector.load %arg9[%c1_147, %c0_148, %c0_149] : memref<2x64x32xf32, #tpu.memory_space<vmem>>, vector<1x64x32xf32>
    %353 = vector.shape_cast %352 : vector<1x64x32xf32> to vector<64x32xf32>
    %cst_150 = arith.constant dense<0.000000e+00> : vector<8x32xf32>
    %354 = tpu.matmul %351, %353, %cst_150 {dimension_numbers = #tpu.dot_dimension_numbers<[1], [0], [0], [1], [0, 0, 1, 1], [], []>} : vector<8x64xf32>, vector<64x32xf32>, vector<8x32xf32> -> vector<8x32xf32>
    %355 = vector.broadcast %214 : vector<1x32xf32> to vector<8x32xf32>
    %356 = arith.addf %354, %355 : vector<8x32xf32>
    %357 = arith.addf %331, %356 : vector<8x32xf32>
    %cst_151 = arith.constant dense<0.000000e+00> : vector<8xf32>
    %358 = vector.multi_reduction <add>, %357, %cst_151 [1] : vector<8x32xf32> to vector<8xf32>
    %359 = vector.shape_cast %358 : vector<8xf32> to vector<8x1xf32>
    %cst_152 = arith.constant 3.200000e+01 : f32
    %360 = vector.broadcast %cst_152 : f32 to vector<8x1xf32>
    %361 = arith.divf %359, %360 : vector<8x1xf32>
    %362 = vector.broadcast %361 : vector<8x1xf32> to vector<8x32xf32>
    %363 = arith.subf %357, %362 : vector<8x32xf32>
    %364 = arith.mulf %363, %363 : vector<8x32xf32>
    %cst_153 = arith.constant dense<0.000000e+00> : vector<8xf32>
    %365 = vector.multi_reduction <add>, %364, %cst_153 [1] : vector<8x32xf32> to vector<8xf32>
    %366 = vector.shape_cast %365 : vector<8xf32> to vector<8x1xf32>
    %cst_154 = arith.constant 3.200000e+01 : f32
    %367 = vector.broadcast %cst_154 : f32 to vector<8x1xf32>
    %368 = arith.divf %366, %367 : vector<8x1xf32>
    %369 = vector.broadcast %361 : vector<8x1xf32> to vector<8x32xf32>
    %370 = arith.subf %357, %369 : vector<8x32xf32>
    %cst_155 = arith.constant 9.99999996E-13 : f32
    %371 = vector.broadcast %cst_155 : f32 to vector<8x1xf32>
    %372 = arith.addf %368, %371 : vector<8x1xf32>
    %373 = math.rsqrt %372 : vector<8x1xf32>
    %374 = vector.broadcast %373 : vector<8x1xf32> to vector<8x32xf32>
    %375 = arith.mulf %370, %374 : vector<8x32xf32>
    %376 = vector.broadcast %220 : vector<1x32xf32> to vector<8x32xf32>
    %377 = arith.mulf %375, %376 : vector<8x32xf32>
    %378 = vector.broadcast %222 : vector<1x32xf32> to vector<8x32xf32>
    %379 = arith.addf %377, %378 : vector<8x32xf32>
    %c0_156 = arith.constant 0 : index
    %c0_157 = arith.constant 0 : index
    %380 = vector.load %arg11[%c0_156, %c0_157] : memref<32x128xf32, #tpu.memory_space<vmem>>, vector<32x128xf32>
    %cst_158 = arith.constant dense<0.000000e+00> : vector<8x128xf32>
    %381 = tpu.matmul %379, %380, %cst_158 {dimension_numbers = #tpu.dot_dimension_numbers<[1], [0], [0], [1], [0, 0, 1, 1], [], []>} : vector<8x32xf32>, vector<32x128xf32>, vector<8x128xf32> -> vector<8x128xf32>
    %c0_159 = arith.constant 0 : index
    %c0_160 = arith.constant 0 : index
    %382 = vector.load %arg12[%c0_159, %c0_160] : memref<1x128xf32, #tpu.memory_space<vmem>>, vector<1x128xf32>
    %383 = vector.broadcast %382 : vector<1x128xf32> to vector<8x128xf32>
    %384 = arith.addf %381, %383 : vector<8x128xf32>
    %c0_161 = arith.constant 0 : index
    %c0_162 = arith.constant 0 : index
    %c0_163 = arith.constant 0 : index
    %385 = vector.load %arg13[%c0_161, %c0_162, %c0_163] : memref<1x8x128xf32, #tpu.memory_space<vmem>>, vector<1x8x128xf32>
    %386 = vector.shape_cast %385 : vector<1x8x128xf32> to vector<8x128xf32>
    %387 = vector.shape_cast %384 : vector<8x128xf32> to vector<1x8x128xf32>
    tpu.vector_store %arg13[%c0_161, %c0_162, %c0_163], %387 {strides = array<i32>} : memref<1x8x128xf32, #tpu.memory_space<vmem>>, vector<1x8x128xf32>,
    return
  }
  func.func @transform_0(%arg0: i32) -> (i32, i32, i32) {
    %c0_i32 = arith.constant 0 : i32
    %c0_i32_0 = arith.constant 0 : i32
    %c0_i32_1 = arith.constant 0 : i32
    return %arg0, %c0_i32, %c0_i32_0 : i32, i32, i32
  }
  func.func @transform_1(%arg0: i32) -> (i32, i32, i32) {
    %c0_i32 = arith.constant 0 : i32
    %c0_i32_0 = arith.constant 0 : i32
    %c0_i32_1 = arith.constant 0 : i32
    return %arg0, %c0_i32, %c0_i32_0 : i32, i32, i32
  }
  func.func @transform_2(%arg0: i32) -> (i32, i32) {
    %c0_i32 = arith.constant 0 : i32
    %c0_i32_0 = arith.constant 0 : i32
    %c0_i32_1 = arith.constant 0 : i32
    return %c0_i32, %c0_i32_0 : i32, i32
  }
  func.func @transform_3(%arg0: i32) -> (i32, i32, i32) {
    %c0_i32 = arith.constant 0 : i32
    %c0_i32_0 = arith.constant 0 : i32
    %c0_i32_1 = arith.constant 0 : i32
    %c0_i32_2 = arith.constant 0 : i32
    return %c0_i32, %c0_i32_0, %c0_i32_1 : i32, i32, i32
  }
  func.func @transform_4(%arg0: i32) -> (i32, i32, i32) {
    %c0_i32 = arith.constant 0 : i32
    %c0_i32_0 = arith.constant 0 : i32
    %c0_i32_1 = arith.constant 0 : i32
    %c0_i32_2 = arith.constant 0 : i32
    return %c0_i32, %c0_i32_0, %c0_i32_1 : i32, i32, i32
  }
  func.func @transform_5(%arg0: i32) -> (i32, i32, i32) {
    %c0_i32 = arith.constant 0 : i32
    %c0_i32_0 = arith.constant 0 : i32
    %c0_i32_1 = arith.constant 0 : i32
    %c0_i32_2 = arith.constant 0 : i32
    return %c0_i32, %c0_i32_0, %c0_i32_1 : i32, i32, i32
  }
  func.func @transform_6(%arg0: i32) -> (i32, i32, i32) {
    %c0_i32 = arith.constant 0 : i32
    %c0_i32_0 = arith.constant 0 : i32
    %c0_i32_1 = arith.constant 0 : i32
    %c0_i32_2 = arith.constant 0 : i32
    return %c0_i32, %c0_i32_0, %c0_i32_1 : i32, i32, i32
  }
  func.func @transform_7(%arg0: i32) -> (i32, i32, i32) {
    %c0_i32 = arith.constant 0 : i32
    %c0_i32_0 = arith.constant 0 : i32
    %c0_i32_1 = arith.constant 0 : i32
    %c0_i32_2 = arith.constant 0 : i32
    return %c0_i32, %c0_i32_0, %c0_i32_1 : i32, i32, i32
  }
  func.func @transform_8(%arg0: i32) -> (i32, i32, i32) {
    %c0_i32 = arith.constant 0 : i32
    %c0_i32_0 = arith.constant 0 : i32
    %c0_i32_1 = arith.constant 0 : i32
    %c0_i32_2 = arith.constant 0 : i32
    return %c0_i32, %c0_i32_0, %c0_i32_1 : i32, i32, i32
  }
  func.func @transform_9(%arg0: i32) -> (i32, i32, i32) {
    %c0_i32 = arith.constant 0 : i32
    %c0_i32_0 = arith.constant 0 : i32
    %c0_i32_1 = arith.constant 0 : i32
    %c0_i32_2 = arith.constant 0 : i32
    return %c0_i32, %c0_i32_0, %c0_i32_1 : i32, i32, i32
  }
  func.func @transform_10(%arg0: i32) -> (i32, i32) {
    %c0_i32 = arith.constant 0 : i32
    %c0_i32_0 = arith.constant 0 : i32
    %c0_i32_1 = arith.constant 0 : i32
    return %c0_i32, %c0_i32_0 : i32, i32
  }
  func.func @transform_11(%arg0: i32) -> (i32, i32) {
    %c0_i32 = arith.constant 0 : i32
    %c0_i32_0 = arith.constant 0 : i32
    %c0_i32_1 = arith.constant 0 : i32
    return %c0_i32, %c0_i32_0 : i32, i32
  }
  func.func @transform_12(%arg0: i32) -> (i32, i32, i32) {
    %c0_i32 = arith.constant 0 : i32
    %c0_i32_0 = arith.constant 0 : i32
    %c0_i32_1 = arith.constant 0 : i32
    return %arg0, %c0_i32, %c0_i32_0 : i32, i32, i32
  }
}

</mosaic_0001>

<bundles_post_ra>
// kernel: model_forward.1
= control target key start
LH: loop header
LB: loop body
LE: loop exit
PB: predicated region body
PF: predicated region fallthrough
CT: control target
= control target key end

     0   :  { %s2317_s0 = inlined_call_operand.vmem [shape: f32[2,8,32], index: 0, kind: input, shape index: {}]   ;;  %s2318_s1 = inlined_call_operand.vmem [shape: f32[2,1,8], index: 1, kind: input, shape index: {}]   ;;  %s2319_s2 = inlined_call_operand.vmem [shape: f32[2,32], index: 2, kind: input, shape index: {}]   ;;  %s2320_s3 = inlined_call_operand.vmem [shape: f32[2,32,96], index: 3, kind: input, shape index: {}]   ;;  %s2321_s4 = inlined_call_operand.vmem [shape: f32[2,1,96], index: 4, kind: input, shape index: {}]   ;;  %s2322_s5 = inlined_call_operand.vmem [shape: f32[2,32,32], index: 5, kind: input, shape index: {}]   ;;  %s2323_s6 = inlined_call_operand.vmem [shape: f32[2,32,64], index: 6, kind: input, shape index: {}]   ;;  %s2324_s7 = inlined_call_operand.vmem [shape: f32[2,1,64], index: 7, kind: input, shape index: {}]   ;;  %s2325_s8 = inlined_call_operand.vmem [shape: f32[2,64,32], index: 8, kind: input, shape index: {}]   ;;  %s2326_s9 = inlined_call_operand.vmem [shape: f32[2,6,32], index: 9, kind: input, shape index: {}]   ;;  %s2327_s10 = inlined_call_operand.vmem [shape: f32[32,128], index: 10, kind: input, shape index: {}]   ;;  %s2328_s11 = inlined_call_operand.vmem [shape: f32[1,128], index: 11, kind: input, shape index: {}]   ;;  %s2329_s12 = inlined_call_operand.hbm [shape: f32[2,8,128], index: 12, kind: output, shape index: {}]  }
   0x1   :  { %2344 = sst [smem:[#allocation5_spill]] %s2317_s0 }
   0x2   :  { %2345 = sst [smem:[#allocation6_spill]] %s2318_s1 }
   0x3   :  { %2346 = sst [smem:[#allocation7_spill]] %s2319_s2 }
   0x4   :  { %2347 = sst [smem:[#allocation8_spill]] %s2320_s3 }
   0x5   :  { %17 = vsyncpa [#allocation3], 0 }
   0x6   :  { %19 = vsyncpa [#allocation3 + $0x1], 0  ;;  %s1874_s21 = smov 0   ;;  %s1876_s22 = smov 0  }
   0x7   :  { %s1878_s23 = smov 0   ;;  %s1880_s24 = smov 0  }
   0x8 LB: > { %s1895_s25 = sadd.s32 4294967295, %s1792_s24   ;;  %s1537_s26 = sadd.s32 4294967294, %s1792_s24   ;;  %s1792_s24 = sphi %s1880_s24, %s2372_s24   ;;  %s1788_s23 = sphi %s1878_s23, %s2371_s23   ;;  %s1784_s22 = sphi %s1876_s22, %s2370_s22   ;;  %s1780_s21 = sphi %s1874_s21, %s2369_s21  }
   0x9   : > { %s1899_s27 = sadd.s32 1, %s1792_s24   ;;  %s294_s28 = sadd.s32 1, %s1788_s23 }
   0xa   : > { %s291_s29 = ssub.s32 %s1792_s24, %s1899_s27  ;;  %p304_p0 = scmp.ne.s32.totalorder %s1788_s23, %s1784_s22 }
   0xb   : > { %p292_p1 = scmp.eq.s32.totalorder %s291_s29, 0  ;;  %p305_p2 = scmp.eq.s32.totalorder %s1895_s25, 1 }
   0xc   : > { %p310_p3 = scmp.ne.s32.totalorder %s1784_s22, %s1780_s21  ;;  %p311_p4 = scmp.eq.s32.totalorder %s1537_s26, 1 }
   0xd   : > { %s1910_s30 = scalar_select %p292_p1, %s1788_s23, %s294_s28  }
   0xe   : > { %p1912_p5 = por %p305_p2, %p304_p0  ;;  %p1916_p6 = por %p311_p4, %p310_p3 }
   0xf   : > { %p1540_p7 = scmp.ge.s32.totalorder %s1792_s24, 1  ;;  %p372_p8 = scmp.lt.s32.totalorder %s1792_s24, 3 }
  0x11   : > { %p373_p9 = pnand %p1540_p7, %p372_p8 }
  0x12   : > { %p416_p10 = scmp.lt.s32.totalorder (!%p373_p9), %s1895_s25, 1  ;;  %s2350_s1 = sld [smem:[#allocation6_spill]] (!%p373_p9) }
  0x13   : > { %376 = sbr.rel (%p373_p9) target bundleno = 4925 (0x133d), region = 68  ;;  %s2351_s0 = sld [smem:[#allocation5_spill]] (!%p373_p9) }
  0x14   : > { %s2352_s3 = sld [smem:[#allocation8_spill]] (!%p373_p9)  ;;  %s2331_s26 = smov (!%p373_p9), 88  }
  0x15   : > { %s2353_s2 = sld [smem:[#allocation7_spill]] (!%p373_p9)  ;;  %s2340_s29 = smov (!%p373_p9), 96  }
  0x16   : > { %s2339_s19 = smov (!%p373_p9), 120   ;;  %s2332_s17 = smov (!%p373_p9), 112  }
  0x17   : > { %s2330_s18 = smov (!%p373_p9), 72   ;;  %s2335_s20 = smov (!%p373_p9), 16  }
  0x18   : > { %s1924_s15 = scalar_select %p416_p10, %s1895_s25, 1  ;;  %vm427_vm0 = vcmask 261120   ;;  %v1794_v2 = vmov 32.0   ;;  %v1665_v33 = vld [vmem:[%s2321_s4] ss:$0 sm:$0xff]  ;;  %vm501_vm5 = vcmask 64512  }
  0x19   : > { %1682 = vrcp.f32 %v1794_v2  ;;  %vm782_vm6 = vcmask 130048   ;;  %vm784_vm7 = vcmask 195584   ;;  %vm890_vm11 = vcmask 523264  }
  0x1a   : > { %s1542_s16 = sshll.u32 %s1924_s15, 3  ;;  %v464_v14 = vld [vmem:[%s2352_s3 + $0x18] sm:$0xff]  ;;  %v463_v15 = vld [vmem:[%s2352_s3 + $0x10] sm:$0xff]  ;;  %v462_v16 = vld [vmem:[%s2352_s3 + $0x8] sm:$0xff] }
  0x1b   : > { %s419_s28 = scalar_lea.vmem %s2351_s0, %s1542_s16  ;;  %484 = vmatpush.msra.mxu0 %v464_v14  ;;  %v461_v17 = vld [vmem:[%s2352_s3] sm:$0xff]  ;;  %s2338_s16 = smov 80  }
  0x1c   : > { %v423_v0 = vld [vmem:[%s419_s28] sm:$0xff]  ;;  %s2342_s28 = smov 64   ;;  %s2358_s0 = smov 80  }
  0x1d   : > { %v428_v1 = vsel %vm427_vm0, %v423_v0, 0.0  ;;  %485 = vmatpush.msra.mxu0 %v463_v15  ;;  %v1663_v27 = vld [vmem:[%s2353_s2] ss:$0 sm:$0xff]  ;;  %v1664_v30 = vld [vmem:[%s2353_s2 + $0x1] ss:$0 sm:$0xff] }
  0x1e   : > { %429 = vadd.xlane.f32.xlu0 %v428_v1 }
  0x1f   : > { %v1683_v3 = vpop.eup %1682  ;;  %486 = vmatpush.msra.mxu0 %v462_v16 }
  0x20   : > { %v432_v4 = vmul.f32 32.0, %v1683_v3  ;;  %vm436_vm1 = vweird.f32 %v1683_v3 }
  0x21   : > { %487 = vmatpush.msra.mxu0 %v461_v17 }
  0x22   : > { %v433_v5 = vsub.f32 1.0, %v432_v4 }
  0x24   : > { %v434_v6 = vmul.f32 %v1683_v3, %v433_v5 }
  0x26   : > { %v435_v7 = vadd.f32 %v1683_v3, %v434_v6 }
  0x28   : > { %v1935_v8 = vsel %vm436_vm1, %v1683_v3, %v435_v7 }
  0x91   : > { %v430_v9 = vpop.xlane.xlu0 %429 }
  0x92   : > { %v438_v10 = vmul.f32 %v1935_v8, %v430_v9 }
  0x94   : > { %v439_v11 = vsub.f32 %v423_v0, %v438_v10 }
  0x96   : > { %v440_v12 = vmul.f32 %v439_v11, %v439_v11 }
  0x98   : > { %v441_v13 = vsel %vm427_vm0, %v440_v12, 0.0 }
  0x99   : > { %442 = vadd.xlane.f32.xlu0 %v441_v13 }
 0x10c   : > { %v443_v18 = vpop.xlane.xlu0 %442 }
 0x10d   : > { %v444_v19 = vmul.f32 %v443_v18, %v1935_v8 }
 0x10f   : > { %v445_v20 = vadd.f32 1e-12, %v444_v19 }
 0x111   : > { %1684 = vrsqrt.f32 %v445_v20  ;;  %vm452_vm3 = vweird.f32 %v445_v20 }
 0x117   : > { %v1685_v21 = vpop.eup %1684 }
 0x118   : > { %v447_v22 = vmul.f32 %v1685_v21, %v445_v20  ;;  %vm453_vm2 = vweird.f32 %v1685_v21 }
 0x119   : > { %vm454_vm4 = vmor %vm452_vm3, %vm453_vm2 }
 0x11a   : > { %v448_v23 = vmul.f32 %v1685_v21, %v447_v22 }
 0x11c   : > { %v449_v24 = vmul.f32 0.5, %v448_v23 }
 0x11e   : > { %v450_v25 = vsub.f32 1.5, %v449_v24 }
 0x120   : > { %v451_v26 = vmul.f32 %v1685_v21, %v450_v25 }
 0x122   : > { %v455_v28 = vsel %vm454_vm4, %v1685_v21, %v451_v26 }
 0x123   : > { %v456_v29 = vmul.f32 %v455_v28, %v439_v11 }
 0x125   : > { %v458_v31 = vmul.f32 %v1663_v27, %v456_v29 }
 0x127   : > { %v1958_v32 = vadd.f32 %v1664_v30, %v458_v31 }
 0x129   : > { %1543 = vmatmul.msk.f32.vlgmr.msra.gmra.mxu0 %vm427_vm0, %v1958_v32 }
 0x1a6   : > { %v489_v34 = vpop.f32.mrf.mxu0 }
 0x1a7   : > { %v1965_v35 = vadd.f32 %v1665_v33, %v489_v34 }
 0x1a9   : > { %570 = vrot.lane.b32.xlu0 %v1965_v35, %s2331_s26  ;;  %542 = vrot.lane.b32.xlu2 %v1965_v35, %s2342_s28  ;;  %s2354_s26 = scalar_lea.vmem %s2350_s1, %s1924_s15  ;;  %s2337_s15 = smov 104  }
 0x1aa   : > { %499 = vrot.lane.b32.xlu1 %v1965_v35, %s2340_s29  ;;  %v1993_v43 = vld [vmem:[%s2354_s26] ss:$0 sm:$0xff]  ;;  %s2334_s26 = smov 40   ;;  %s2355_s28 = smov 64  }
 0x1ab   : > { %s2363_s29 = smov 56  }
 0x1b1   : > { %637 = vrot.lane.b32.xlu0 %v1965_v35, %s2338_s16  ;;  %568 = vrot.lane.b32.xlu2 %v1965_v35, %s2339_s19  ;;  %s2356_s19 = smov 96   ;;  %s2364_s16 = smov 40  }
 0x1b9   : > { %635 = vrot.lane.b32.xlu0 %v1965_v35, %s2332_s17  ;;  %704 = vrot.lane.b32.xlu2 %v1965_v35, %s2330_s18  ;;  %s2333_s17 = smov 48   ;;  %s2336_s18 = smov 56  }
 0x203   : > { %v543_v36 = vpop.permute.xlu2 %542 }
 0x204   : > { %563 = vmatpush.msra.mxu3 %v543_v36 }
 0x20b   : > { %v569_v37 = vpop.permute.xlu2 %568 }
 0x213   : > { %v705_v38 = vpop.permute.xlu2 %704 }
 0x214   : > { %1553 = vmatpush.xpose.msk.msrb.mxu0 %vm501_vm5, %v705_v38  ;;  %v789_v38 = vld [vmem:[%s2322_s5 + $0x18] sm:$0xff] }
 0x21b   : > { %v571_v39 = vpop.permute.xlu0 %570 }
 0x21c   : > { %v500_v40 = vpop.permute.xlu1 %499  ;;  %1547 = vmatpush.xpose.msk.msrb.mxu3 %vm501_vm5, %v571_v39  ;;  %v788_v39 = vld [vmem:[%s2322_s5 + $0x10] sm:$0xff] }
 0x21d   : > { %1544 = vmatpush.xpose.msk.msra.mxu1 %vm501_vm5, %v500_v40  ;;  %v787_v40 = vld [vmem:[%s2322_s5 + $0x8] sm:$0xff] }
 0x220   : > { %1545 = vmatmul.msk.f32.vlgmr.msra.gmra.mxu1 %vm501_vm5, %v1965_v35 }
 0x223   : > { %v638_v41 = vpop.permute.xlu0 %637 }
 0x224   : > { %1550 = vmatpush.xpose.msk.msrb.mxu1 %vm501_vm5, %v638_v41  ;;  %v786_v41 = vld [vmem:[%s2322_s5] sm:$0xff] }
 0x228   : > { %806 = vmatpush.msra.mxu1 %v789_v38 }
 0x22a   : > { %807 = vmatpush.msra.mxu1 %v788_v39 }
 0x22b   : > { %v636_v42 = vpop.permute.xlu0 %635 }
 0x22c   : > { %1551 = vmatmul.msk.f32.vlgmr.msrb.gmra.mxu1 %vm501_vm5, %v636_v42 }
 0x22d   : > { %808 = vmatpush.msra.mxu1 %v787_v40 }
 0x22f   : > { %809 = vmatpush.msra.mxu1 %v786_v41 }
 0x29d   : > { %v523_v44 = vpop.f32.mrf.mxu1 }
 0x29e   : > { %v526_v45 = vmul.f32 0.35355338, %v523_v44 }
 0x2a0   : > { %v530_v46 = vadd.f32 %v1993_v43, %v526_v45 }
 0x2a2   : > { %v531_v47 = vsel %vm501_vm5, %v530_v46, -inf }
 0x2a3   : > { %532 = vmax.xlane.f32.xlu1 %v531_v47 }
 0x2a9   : > { %v660_v48 = vpop.f32.mrf.mxu1 }
 0x2aa   : > { %v663_v49 = vmul.f32 0.35355338, %v660_v48 }
 0x2ac   : > { %v664_v50 = vadd.f32 %v1993_v43, %v663_v49  ;;  %v1666_v49 = vld [vmem:[%s2326_s9] ss:$0 sm:$0xff] }
 0x2ae   : > { %v665_v51 = vsel %vm501_vm5, %v664_v50, -inf }
 0x2af   : > { %666 = vmax.xlane.f32.xlu0 %v665_v51 }
 0x2c3   : > { %676 = vrot.lane.b32.xlu0 %v1965_v35, %s2333_s17  ;;  %s2341_s17 = smov 8  }
 0x316   : > { %v533_v52 = vpop.xlane.xlu1 %532 }
 0x317   : > { %v534_v53 = vsub.f32 %v530_v46, %v533_v52 }
 0x319   : > { %v535_v54 = vmul.f32 1.442695, %v534_v53 }
 0x31b   : > { %1686 = vpow2.f32 %v535_v54 }
 0x321   : > { %v1687_v55 = vpop.eup %1686 }
 0x322   : > { %v537_v56 = vsel %vm501_vm5, %v1687_v55, 0.0  ;;  %v667_v58 = vpop.xlane.xlu0 %666 }
 0x323   : > { %538 = vadd.xlane.f32.xlu2 %v537_v56  ;;  %v668_v4 = vsub.f32 %v664_v50, %v667_v58 }
 0x325   : > { %v669_v5 = vmul.f32 1.442695, %v668_v4 }
 0x335   : > { %v677_v62 = vpop.permute.xlu0 %676 }
 0x33b   : > { %702 = vrot.lane.b32.xlu2 %v1965_v35, %s2337_s15  ;;  %s2360_s15 = smov 88  }
 0x396   : > { %v539_v57 = vpop.xlane.xlu2 %538 }
 0x397   : > { %1688 = vrcp.f32 %v539_v57 }
 0x398   : > { %1690 = vpow2.f32 %v669_v5 }
 0x39d   : > { %v1689_v59 = vpop.eup %1688 }
 0x39e   : > { %v703_v60 = vpop.permute.xlu2 %702  ;;  %v541_v61 = vmul.f32 %v1689_v59, %v1687_v55  ;;  %v1691_v11 = vpop.eup %1690  ;;  %v844_v59 = vld [vmem:[%s2323_s6 + $0x18] sm:$0xff] }
 0x39f   : > { %1554 = vmatmul.msk.f32.vlgmr.msrb.gmra.mxu0 %vm501_vm5, %v703_v60  ;;  %v671_v12 = vsel %vm501_vm5, %v1691_v11, 0.0  ;;  %v842_v60 = vld [vmem:[%s2323_s6 + $0x8] sm:$0xff] }
 0x3a0   : > { %1546 = vmatmul.msk.f32.vlgmr.msra.gmra.mxu3 %vm501_vm5, %v541_v61  ;;  %v841_v61 = vld [vmem:[%s2323_s6] sm:$0xff] }
 0x3a1   : > { %697 = vmatpush.msra.mxu3 %v677_v62 }
 0x3a8   : > { %1548 = vmatmul.msk.f32.vlgmr.msrb.gmra.mxu3 %vm501_vm5, %v569_v37 }
 0x3a9   : > { %864 = vmatpush.msrb.mxu3 %v844_v59  ;;  %v1671_v59 = vld [vmem:[%s2326_s9 + $0x4] ss:$0 sm:$0xff] }
 0x41c   : > { %v727_v63 = vpop.f32.mrf.mxu0 }
 0x41d   : > { %v730_v0 = vmul.f32 0.35355338, %v727_v63 }
 0x41f   : > { %v731_v1 = vadd.f32 %v1993_v43, %v730_v0 }
 0x421   : > { %v732_v2 = vsel %vm501_vm5, %v731_v1, -inf }
 0x422   : > { %733 = vmax.xlane.f32.xlu2 %v732_v2 }
 0x423   : > { %v2009_v3 = vpop.f32.mrf.mxu3 }
 0x42b   : > { %v593_v6 = vpop.f32.mrf.mxu3 }
 0x42c   : > { %v596_v7 = vmul.f32 0.35355338, %v593_v6 }
 0x42e   : > { %v597_v9 = vadd.f32 %v1993_v43, %v596_v7  ;;  %v1667_v7 = vld [vmem:[%s2326_s9 + $0x2] ss:$0 sm:$0xff] }
 0x430   : > { %v598_v10 = vsel %vm501_vm5, %v597_v9, -inf }
 0x431   : > { %599 = vmax.xlane.f32.xlu1 %v598_v10 }
 0x439   : > { %672 = vadd.xlane.f32.xlu1 %v671_v12 }
 0x43a   : > { %743 = vrot.lane.b32.xlu2 %v1965_v35, %s2334_s26  ;;  %s2343_s26 = smov 24  }
 0x495   : > { %v734_v13 = vpop.xlane.xlu2 %733 }
 0x496   : > { %v735_v14 = vsub.f32 %v731_v1, %v734_v13 }
 0x498   : > { %v736_v15 = vmul.f32 1.442695, %v735_v14  ;;  %v888_v14 = vld [vmem:[%s2325_s8 + $0x38] sm:$0xff] }
 0x499   : > { %902 = vmatpush.msra.mxu0 %v888_v14 }
 0x49a   : > { %1692 = vpow2.f32 %v736_v15  ;;  %v887_v15 = vld [vmem:[%s2325_s8 + $0x30] sm:$0xff] }
 0x49b   : > { %903 = vmatpush.msra.mxu0 %v887_v15 }
 0x49d   : > { %v744_v33 = vpop.permute.xlu2 %743 }
 0x4a0   : > { %v1693_v16 = vpop.eup %1692 }
 0x4a1   : > { %v738_v17 = vsel %vm501_vm5, %v1693_v16, 0.0 }
 0x4a2   : > { %739 = vadd.xlane.f32.xlu1 %v738_v17  ;;  %v885_v17 = vld [vmem:[%s2325_s8 + $0x20] sm:$0xff] }
 0x4a4   : > { %v600_v18 = vpop.xlane.xlu1 %599 }
 0x4a5   : > { %v601_v19 = vsub.f32 %v597_v9, %v600_v18  ;;  %v884_v18 = vld [vmem:[%s2325_s8 + $0x18] sm:$0xff] }
 0x4a7   : > { %v602_v20 = vmul.f32 1.442695, %v601_v19  ;;  %v883_v19 = vld [vmem:[%s2325_s8 + $0x10] sm:$0xff] }
 0x4a9   : > { %1694 = vpow2.f32 %v602_v20  ;;  %v882_v20 = vld [vmem:[%s2325_s8 + $0x8] sm:$0xff] }
 0x4ac   : > { %v673_v21 = vpop.xlane.xlu1 %672 }
 0x4ad   : > { %1696 = vrcp.f32 %v673_v21  ;;  %v881_v21 = vld [vmem:[%s2325_s8] sm:$0xff] }
 0x4af   : > { %v1695_v22 = vpop.eup %1694 }
 0x4b0   : > { %v604_v23 = vsel %vm501_vm5, %v1695_v22, 0.0 }
 0x4b1   : > { %605 = vadd.xlane.f32.xlu1 %v604_v23 }
 0x4b3   : > { %v1697_v24 = vpop.eup %1696 }
 0x4b4   : > { %v675_v25 = vmul.f32 %v1697_v24, %v1691_v11  ;;  %v1668_v11 = vld [vmem:[%s2326_s9 + $0x3] ss:$0 sm:$0xff] }
 0x4b6   : > { %1552 = vmatmul.msk.f32.vlgmr.msra.gmra.mxu3 %vm501_vm5, %v675_v25 }
 0x4ca   : > { %609 = vrot.lane.b32.xlu1 %v1965_v35, %s2336_s18  ;;  %s2361_s18 = smov 72  }
 0x515   : > { %v740_v26 = vpop.xlane.xlu1 %739 }
 0x524   : > { %v606_v27 = vpop.xlane.xlu1 %605 }
 0x525   : > { %1698 = vrcp.f32 %v606_v27 }
 0x526   : > { %1700 = vrcp.f32 %v740_v26 }
 0x52b   : > { %v1699_v28 = vpop.eup %1698 }
 0x52c   : > { %v608_v31 = vmul.f32 %v1699_v28, %v1695_v22  ;;  %v1701_v34 = vpop.eup %1700  ;;  %v1669_v22 = vld [vmem:[%s2324_s7] ss:$0 sm:$0xff] }
 0x52d   : > { %v742_v36 = vmul.f32 %v1701_v34, %v1693_v16  ;;  %v886_v16 = vld [vmem:[%s2325_s8 + $0x28] sm:$0xff] }
 0x52e   : > { %904 = vmatpush.msra.mxu0 %v886_v16 }
 0x530   : > { %905 = vmatpush.msra.mxu0 %v885_v17 }
 0x532   : > { %906 = vmatpush.msra.mxu0 %v884_v18 }
 0x534   : > { %907 = vmatpush.msra.mxu0 %v883_v19 }
 0x536   : > { %908 = vmatpush.msra.mxu0 %v882_v20 }
 0x538   : > { %909 = vmatpush.msra.mxu0 %v881_v21 }
 0x539   : > { %v699_v29 = vpop.f32.mrf.mxu3 }
 0x53a   : > { %774 = vrot.lane.b32.xlu0 %v699_v29, %s2335_s20  ;;  %s2362_s20 = smov 104  }
 0x53c   : > { %v610_v30 = vpop.permute.xlu1 %609 }
 0x53d   : > { %630 = vmatpush.msra.mxu2 %v610_v30 }
 0x53e   : > { %1549 = vmatmul.msk.f32.vlgmr.msra.gmra.mxu2 %vm501_vm5, %v608_v31 }
 0x53f   : > { %764 = vmatpush.msrb.mxu2 %v744_v33 }
 0x546   : > { %1555 = vmatmul.msk.f32.vlgmr.msrb.gmra.mxu2 %vm501_vm5, %v742_v36  ;;  %v1670_v36 = vld [vmem:[%s2326_s9 + $0x1] ss:$0 sm:$0xff] }
 0x5ac   : > { %v775_v45 = vpop.permute.xlu0 %774 }
 0x5c1   : > { %v632_v35 = vpop.f32.mrf.mxu2 }
 0x5c2   : > { %770 = vrot.lane.b32.xlu1 %v632_v35, %s2341_s17  ;;  %s2357_s17 = smov 120  }
 0x5c9   : > { %v766_v37 = vpop.f32.mrf.mxu2 }
 0x5ca   : > { %778 = vrot.lane.b32.xlu1 %v766_v37, %s2343_s26  ;;  %s2359_s26 = smov 112  }
 0x634   : > { %v771_v42 = vpop.permute.xlu1 %770 }
 0x635   : > { %v781_v44 = vsel %vm501_vm5, %v2009_v3, %v771_v42 }
 0x636   : > { %v783_v46 = vsel %vm782_vm6, %v781_v44, %v775_v45 }
 0x63c   : > { %v779_v47 = vpop.permute.xlu1 %778 }
 0x63d   : > { %v785_v48 = vsel %vm784_vm7, %v783_v46, %v779_v47  ;;  %v1562_v46 = vld [vmem:[%s2352_s3 + $0x38] sm:$0xff]  ;;  %v1561_v47 = vld [vmem:[%s2352_s3 + $0x30] sm:$0xff] }
 0x63e   : > { %1556 = vmatmul.msk.f32.vlgmr.msra.gmra.mxu1 %vm427_vm0, %v785_v48  ;;  %966 = vmatpush.msra.mxu2 %v1562_v46  ;;  %v1560_v48 = vld [vmem:[%s2352_s3 + $0x28] sm:$0xff] }
 0x640   : > { %967 = vmatpush.msra.mxu2 %v1561_v47 }
 0x642   : > { %968 = vmatpush.msra.mxu2 %v1560_v48 }
 0x6bb   : > { %v811_v50 = vpop.f32.mrf.mxu1 }
 0x6bc   : > { %v812_v51 = vadd.f32 %v1666_v49, %v811_v50  ;;  %v1559_v49 = vld [vmem:[%s2352_s3 + $0x20] sm:$0xff] }
 0x6bd   : > { %969 = vmatpush.msra.mxu2 %v1559_v49 }
 0x6be   : > { %v814_v52 = vadd.f32 %v812_v51, %v1958_v32  ;;  %v843_v32 = vld [vmem:[%s2323_s6 + $0x10] sm:$0xff] }
 0x6bf   : > { %865 = vmatpush.msrb.mxu3 %v843_v32 }
 0x6c0   : > { %v815_v53 = vsel %vm427_vm0, %v814_v52, 0.0 }
 0x6c1   : > { %816 = vadd.xlane.f32.xlu2 %v815_v53  ;;  %866 = vmatpush.msrb.mxu3 %v842_v60 }
 0x6c3   : > { %867 = vmatpush.msrb.mxu3 %v841_v61  ;;  %v1672_v61 = vld [vmem:[%s2326_s9 + $0x5] ss:$0 sm:$0xff] }
 0x734   : > { %v817_v54 = vpop.xlane.xlu2 %816 }
 0x735   : > { %v818_v55 = vmul.f32 %v817_v54, %v1935_v8 }
 0x737   : > { %v819_v56 = vsub.f32 %v814_v52, %v818_v55 }
 0x739   : > { %v820_v57 = vmul.f32 %v819_v56, %v819_v56 }
 0x73b   : > { %v821_v58 = vsel %vm427_vm0, %v820_v57, 0.0 }
 0x73c   : > { %822 = vadd.xlane.f32.xlu0 %v821_v58 }
 0x7af   : > { %v823_v62 = vpop.xlane.xlu0 %822 }
 0x7b0   : > { %v824_v63 = vmul.f32 %v823_v62, %v1935_v8 }
 0x7b2   : > { %v825_v0 = vadd.f32 1e-12, %v824_v63 }
 0x7b4   : > { %1702 = vrsqrt.f32 %v825_v0  ;;  %vm832_vm9 = vweird.f32 %v825_v0 }
 0x7ba   : > { %v1703_v1 = vpop.eup %1702 }
 0x7bb   : > { %v827_v2 = vmul.f32 %v1703_v1, %v825_v0  ;;  %vm833_vm8 = vweird.f32 %v1703_v1  ;;  %v1673_v0 = vld [vmem:[%s2321_s4 + $0x1] ss:$0 sm:$0xff] }
 0x7bc   : > { %vm834_vm10 = vmor %vm832_vm9, %vm833_vm8 }
 0x7bd   : > { %v828_v3 = vmul.f32 %v1703_v1, %v827_v2 }
 0x7bf   : > { %v829_v4 = vmul.f32 0.5, %v828_v3 }
 0x7c1   : > { %v830_v5 = vsub.f32 1.5, %v829_v4 }
 0x7c3   : > { %v831_v6 = vmul.f32 %v1703_v1, %v830_v5 }
 0x7c5   : > { %v835_v9 = vsel %vm834_vm10, %v1703_v1, %v831_v6 }
 0x7c6   : > { %v836_v10 = vmul.f32 %v835_v9, %v819_v56 }
 0x7c8   : > { %v838_v12 = vmul.f32 %v1667_v7, %v836_v10 }
 0x7ca   : > { %v840_v13 = vadd.f32 %v1668_v11, %v838_v12 }
 0x7cc   : > { %1557 = vmatmul.msk.f32.vlgmr.msrb.gmra.mxu3 %vm427_vm0, %v840_v13 }
 0x84f   : > { %v869_v23 = vpop.f32.mrf.mxu3 }
 0x850   : > { %v870_v24 = vadd.f32 %v1669_v22, %v869_v23 }
 0x852   : > { %v873_v25 = vmul.f32 0.044715, %v870_v24  ;;  %v872_v31 = vmul.f32 0.5, %v870_v24 }
 0x854   : > { %v874_v26 = vmul.f32 %v873_v25, %v870_v24 }
 0x856   : > { %v875_v27 = vmul.f32 %v874_v26, %v870_v24 }
 0x858   : > { %v876_v28 = vadd.f32 %v875_v27, %v870_v24 }
 0x85a   : > { %v877_v29 = vmul.f32 0.7978846, %v876_v28 }
 0x85c   : > { %1704 = vtanh.f32 %v877_v29 }
 0x862   : > { %v1705_v30 = vpop.eup %1704 }
 0x863   : > { %v879_v33 = vadd.f32 1.0, %v1705_v30 }
 0x865   : > { %v880_v34 = vmul.f32 %v879_v33, %v872_v31 }
 0x867   : > { %1558 = vmatmul.msk.f32.vlgmr.msra.gmra.mxu0 %vm890_vm11, %v880_v34 }
 0x8e4   : > { %v911_v35 = vpop.f32.mrf.mxu0 }
 0x8e5   : > { %v912_v37 = vadd.f32 %v1670_v36, %v911_v35 }
 0x8e7   : > { %v914_v38 = vadd.f32 %v912_v37, %v840_v13 }
 0x8e9   : > { %v915_v39 = vsel %vm427_vm0, %v914_v38, 0.0 }
 0x8ea   : > { %916 = vadd.xlane.f32.xlu1 %v915_v39 }
 0x95d   : > { %v917_v40 = vpop.xlane.xlu1 %916 }
 0x95e   : > { %v918_v41 = vmul.f32 %v917_v40, %v1935_v8 }
 0x960   : > { %v919_v42 = vsub.f32 %v914_v38, %v918_v41 }
 0x962   : > { %v920_v44 = vmul.f32 %v919_v42, %v919_v42 }
 0x964   : > { %v921_v45 = vsel %vm427_vm0, %v920_v44, 0.0 }
 0x965   : > { %922 = vadd.xlane.f32.xlu2 %v921_v45 }
 0x9d8   : > { %v923_v50 = vpop.xlane.xlu2 %922 }
 0x9d9   : > { %v924_v51 = vmul.f32 %v923_v50, %v1935_v8 }
 0x9db   : > { %v925_v52 = vadd.f32 1e-12, %v924_v51 }
 0x9dd   : > { %1706 = vrsqrt.f32 %v925_v52  ;;  %vm932_vm13 = vweird.f32 %v925_v52 }
 0x9e3   : > { %v1707_v53 = vpop.eup %1706 }
 0x9e4   : > { %v927_v54 = vmul.f32 %v1707_v53, %v925_v52  ;;  %vm933_vm12 = vweird.f32 %v1707_v53 }
 0x9e5   : > { %vm934_vm14 = vmor %vm932_vm13, %vm933_vm12 }
 0x9e6   : > { %v928_v55 = vmul.f32 %v1707_v53, %v927_v54 }
 0x9e8   : > { %v929_v56 = vmul.f32 0.5, %v928_v55 }
 0x9ea   : > { %v930_v57 = vsub.f32 1.5, %v929_v56 }
 0x9ec   : > { %v931_v58 = vmul.f32 %v1707_v53, %v930_v57 }
 0x9ee   : > { %v935_v32 = vsel %vm934_vm14, %v1707_v53, %v931_v58 }
 0x9ef   : > { %v936_v60 = vmul.f32 %v935_v32, %v919_v42 }
 0x9f1   : > { %v938_v62 = vmul.f32 %v1671_v59, %v936_v60 }
 0x9f3   : > { %v2123_v63 = vadd.f32 %v1672_v61, %v938_v62 }
 0x9f5   : > { %1564 = vmatmul.msk.f32.vlgmr.msra.gmra.mxu2 %vm427_vm0, %v2123_v63 }
 0xa78   : > { %v971_v1 = vpop.f32.mrf.mxu2 }
 0xa79   : > { %v2130_v2 = vadd.f32 %v1673_v0, %v971_v1 }
 0xa7b   : > { %1021 = vrot.lane.b32.xlu2 %v2130_v2, %s2355_s28  ;;  %982 = vrot.lane.b32.xlu0 %v2130_v2, %s2356_s19  ;;  %s2365_s28 = smov 48   ;;  %s2366_s19 = smov 8  }
 0xa83   : > { %1047 = vrot.lane.b32.xlu0 %v2130_v2, %s2357_s17  ;;  %s2367_s17 = smov 24  }
 0xa8b   : > { %1116 = vrot.lane.b32.xlu0 %v2130_v2, %s2358_s0  ;;  %s2368_s0 = smov 16  }
 0xa93   : > { %1114 = vrot.lane.b32.xlu0 %v2130_v2, %s2359_s26 }
 0xad5   : > { %v1022_v3 = vpop.permute.xlu2 %1021 }
 0xad6   : > { %1042 = vmatpush.msra.mxu3 %v1022_v3 }
 0xaed   : > { %v983_v4 = vpop.permute.xlu0 %982 }
 0xaee   : > { %1571 = vmatpush.xpose.msk.msrb.mxu1 %vm501_vm5, %v983_v4  ;;  %v1586_v4 = vld [vmem:[%s2322_s5 + $0x38] sm:$0xff] }
 0xaf1   : > { %1572 = vmatmul.msk.f32.vlgmr.msrb.gmra.mxu1 %vm501_vm5, %v2130_v2 }
 0xaf5   : > { %v1048_v5 = vpop.permute.xlu0 %1047 }
 0xafd   : > { %v1117_v6 = vpop.permute.xlu0 %1116 }
 0xafe   : > { %1577 = vmatpush.xpose.msk.msrb.mxu3 %vm501_vm5, %v1117_v6  ;;  %v1584_v6 = vld [vmem:[%s2322_s5 + $0x28] sm:$0xff] }
 0xb05   : > { %v1115_v23 = vpop.permute.xlu0 %1114 }
 0xb6e   : > { %v1005_v7 = vpop.f32.mrf.mxu1 }
 0xb6f   : > { %v1008_v9 = vmul.f32 0.35355338, %v1005_v7  ;;  %v1583_v7 = vld [vmem:[%s2322_s5 + $0x20] sm:$0xff] }
 0xb71   : > { %v1009_v10 = vadd.f32 %v1993_v43, %v1008_v9 }
 0xb73   : > { %v1010_v11 = vsel %vm501_vm5, %v1009_v10, -inf }
 0xb74   : > { %1011 = vmax.xlane.f32.xlu1 %v1010_v11 }
 0xb8d   : > { %1049 = vrot.lane.b32.xlu1 %v2130_v2, %s2360_s15 }
 0xb95   : > { %1183 = vrot.lane.b32.xlu1 %v2130_v2, %s2361_s18 }
 0xbe7   : > { %v1012_v12 = vpop.xlane.xlu1 %1011 }
 0xbe8   : > { %v1013_v13 = vsub.f32 %v1009_v10, %v1012_v12 }
 0xbea   : > { %v1014_v14 = vmul.f32 1.442695, %v1013_v13 }
 0xbec   : > { %1708 = vpow2.f32 %v1014_v14 }
 0xbf2   : > { %v1709_v15 = vpop.eup %1708 }
 0xbf3   : > { %v1016_v16 = vsel %vm501_vm5, %v1709_v15, 0.0 }
 0xbf4   : > { %1017 = vadd.xlane.f32.xlu2 %v1016_v16 }
 0xbff   : > { %v1050_v17 = vpop.permute.xlu1 %1049 }
 0xc00   : > { %1574 = vmatpush.xpose.msk.msrb.mxu2 %vm501_vm5, %v1050_v17 }
 0xc03   : > { %1575 = vmatmul.msk.f32.vlgmr.msrb.gmra.mxu2 %vm501_vm5, %v1048_v5  ;;  %v1585_v5 = vld [vmem:[%s2322_s5 + $0x30] sm:$0xff] }
 0xc07   : > { %v1184_v18 = vpop.permute.xlu1 %1183 }
 0xc08   : > { %1580 = vmatpush.xpose.msk.msra.mxu2 %vm501_vm5, %v1184_v18 }
 0xc0c   : > { %1181 = vrot.lane.b32.xlu2 %v2130_v2, %s2362_s20 }
 0xc67   : > { %v1018_v19 = vpop.xlane.xlu2 %1017 }
 0xc68   : > { %1710 = vrcp.f32 %v1018_v19 }
 0xc6e   : > { %v1711_v20 = vpop.eup %1710 }
 0xc6f   : > { %v1020_v21 = vmul.f32 %v1711_v20, %v1709_v15  ;;  %v1182_v22 = vpop.permute.xlu2 %1181  ;;  %v1674_v15 = vld [vmem:[%s2326_s9 + $0x8] ss:$0 sm:$0xff] }
 0xc70   : > { %1581 = vmatmul.msk.f32.vlgmr.msra.gmra.mxu2 %vm501_vm5, %v1182_v22 }
 0xc71   : > { %1573 = vmatmul.msk.f32.vlgmr.msra.gmra.mxu3 %vm501_vm5, %v1020_v21 }
 0xc72   : > { %1284 = vmatpush.msra.mxu3 %v1586_v4 }
 0xc74   : > { %1285 = vmatpush.msra.mxu3 %v1585_v5 }
 0xc76   : > { %1286 = vmatpush.msra.mxu3 %v1584_v6 }
 0xc78   : > { %1287 = vmatpush.msra.mxu3 %v1583_v7 }
 0xc79   : > { %1578 = vmatmul.msk.f32.vlgmr.msrb.gmra.mxu3 %vm501_vm5, %v1115_v23 }
 0xc86   : > { %v1072_v24 = vpop.f32.mrf.mxu2 }
 0xc87   : > { %v1075_v25 = vmul.f32 0.35355338, %v1072_v24 }
 0xc89   : > { %v1076_v26 = vadd.f32 %v1993_v43, %v1075_v25  ;;  %v1591_v25 = vld [vmem:[%s2323_s6 + $0x38] sm:$0xff] }
 0xc8b   : > { %v1077_v27 = vsel %vm501_vm5, %v1076_v26, -inf }
 0xc8c   : > { %1078 = vmax.xlane.f32.xlu1 %v1077_v27  ;;  %v1588_v27 = vld [vmem:[%s2323_s6 + $0x20] sm:$0xff] }
 0xcf3   : > { %v1206_v28 = vpop.f32.mrf.mxu2 }
 0xcf4   : > { %v1209_v29 = vmul.f32 0.35355338, %v1206_v28  ;;  %v2163_v30 = vpop.f32.mrf.mxu3 }
 0xcf6   : > { %v1210_v31 = vadd.f32 %v1993_v43, %v1209_v29 }
 0xcf8   : > { %v1211_v33 = vsel %vm501_vm5, %v1210_v31, -inf }
 0xcf9   : > { %1212 = vmax.xlane.f32.xlu2 %v1211_v33 }
 0xcfc   : > { %v1139_v34 = vpop.f32.mrf.mxu3 }
 0xcfd   : > { %v1142_v36 = vmul.f32 0.35355338, %v1139_v34 }
 0xcff   : > { %v1079_v35 = vpop.xlane.xlu1 %1078  ;;  %v1143_v37 = vadd.f32 %v1993_v43, %v1142_v36 }
 0xd00   : > { %v1080_v38 = vsub.f32 %v1076_v26, %v1079_v35  ;;  %v1589_v26 = vld [vmem:[%s2323_s6 + $0x28] sm:$0xff] }
 0xd01   : > { %v1144_v39 = vsel %vm501_vm5, %v1143_v37, -inf }
 0xd02   : > { %v1081_v40 = vmul.f32 1.442695, %v1080_v38  ;;  %1145 = vmax.xlane.f32.xlu0 %v1144_v39  ;;  %v1675_v38 = vld [vmem:[%s2326_s9 + $0xa] ss:$0 sm:$0xff] }
 0xd04   : > { %1712 = vpow2.f32 %v1081_v40 }
 0xd0a   : > { %v1713_v41 = vpop.eup %1712 }
 0xd0b   : > { %v1083_v42 = vsel %vm501_vm5, %v1713_v41, 0.0 }
 0xd0c   : > { %1084 = vadd.xlane.f32.xlu1 %v1083_v42 }
 0xd25   : > { %1088 = vrot.lane.b32.xlu1 %v2130_v2, %s2363_s29  ;;  %s413_s29 = sand.u32 1, %s1784_s22  }
 0xd26   : > { %s1454_s20 = scalar_lea.sflag [#allocation3], %s413_s29 }
 0xd6c   : > { %v1213_v44 = vpop.xlane.xlu2 %1212 }
 0xd6d   : > { %v1214_v45 = vsub.f32 %v1210_v31, %v1213_v44 }
 0xd6f   : > { %v1215_v46 = vmul.f32 1.442695, %v1214_v45  ;;  %v1601_v45 = vld [vmem:[%s2325_s8 + $0x78] sm:$0xff] }
 0xd70   : > { %1382 = vmatpush.msrb.mxu2 %v1601_v45 }
 0xd71   : > { %1714 = vpow2.f32 %v1215_v46  ;;  %v1600_v46 = vld [vmem:[%s2325_s8 + $0x70] sm:$0xff] }
 0xd72   : > { %1383 = vmatpush.msrb.mxu2 %v1600_v46 }
 0xd75   : > { %v1146_v47 = vpop.xlane.xlu0 %1145 }
 0xd76   : > { %v1147_v48 = vsub.f32 %v1143_v37, %v1146_v47  ;;  %v1599_v47 = vld [vmem:[%s2325_s8 + $0x68] sm:$0xff] }
 0xd77   : > { %v1715_v43 = vpop.eup %1714  ;;  %1384 = vmatpush.msrb.mxu2 %v1599_v47 }
 0xd78   : > { %v1148_v49 = vmul.f32 1.442695, %v1147_v48  ;;  %v1217_v50 = vsel %vm501_vm5, %v1715_v43, 0.0  ;;  %v1598_v48 = vld [vmem:[%s2325_s8 + $0x60] sm:$0xff] }
 0xd79   : > { %1218 = vadd.xlane.f32.xlu2 %v1217_v50  ;;  %1385 = vmatpush.msrb.mxu2 %v1598_v48  ;;  %v1595_v50 = vld [vmem:[%s2325_s8 + $0x48] sm:$0xff] }
 0xd7a   : > { %1716 = vpow2.f32 %v1148_v49  ;;  %v1596_v49 = vld [vmem:[%s2325_s8 + $0x50] sm:$0xff] }
 0xd7f   : > { %v1085_v53 = vpop.xlane.xlu1 %1084 }
 0xd80   : > { %v1717_v51 = vpop.eup %1716  ;;  %1718 = vrcp.f32 %v1085_v53 }
 0xd81   : > { %v1150_v52 = vsel %vm501_vm5, %v1717_v51, 0.0 }
 0xd82   : > { %1151 = vadd.xlane.f32.xlu0 %v1150_v52  ;;  %v1677_v52 = vld [vmem:[%s2324_s7 + $0x1] ss:$0 sm:$0xff] }
 0xd86   : > { %v1719_v54 = vpop.eup %1718 }
 0xd87   : > { %v1087_v55 = vmul.f32 %v1719_v54, %v1713_v41  ;;  %v1676_v41 = vld [vmem:[%s2326_s9 + $0xb] ss:$0 sm:$0xff] }
 0xd91   : > { %1222 = vrot.lane.b32.xlu2 %v2130_v2, %s2364_s16  ;;  %s1541_s16 = sshll.u32 %s413_s29, 3 }
 0xd92   : > { %s415_s1 = scalar_lea.vmem [#allocation2], %s1541_s16 }
 0xd93   : > { %s1466_s2 = sshll.u32 %s415_s1, 4  ;;  %s1467_s2 = int_to_ptr.vmem [resolvable:$true] %s1466_s2 }
 0xd96   : > { %1155 = vrot.lane.b32.xlu0 %v2130_v2, %s2365_s28  ;;  %s1605_s28 = sshll.u32 %s1895_s25, 3 }
 0xd97   : > { %v1089_v56 = vpop.permute.xlu1 %1088 }
 0xd98   : > { %1109 = vmatpush.msra.mxu1 %v1089_v56 }
 0xd99   : > { %1576 = vmatmul.msk.f32.vlgmr.msra.gmra.mxu1 %vm501_vm5, %v1087_v55 }
 0xdec   : > { %v1219_v57 = vpop.xlane.xlu2 %1218 }
 0xded   : > { %1720 = vrcp.f32 %v1219_v57 }
 0xdf3   : > { %v1721_v58 = vpop.eup %1720 }
 0xdf4   : > { %v1221_v59 = vmul.f32 %v1721_v58, %v1715_v43  ;;  %v1223_v32 = vpop.permute.xlu2 %1222  ;;  %v1597_v43 = vld [vmem:[%s2325_s8 + $0x58] sm:$0xff] }
 0xdf5   : > { %1243 = vmatpush.msrb.mxu1 %v1223_v32  ;;  %v1152_v60 = vpop.xlane.xlu0 %1151  ;;  %1386 = vmatpush.msrb.mxu2 %v1597_v43 }
 0xdf6   : > { %1582 = vmatmul.msk.f32.vlgmr.msrb.gmra.mxu1 %vm501_vm5, %v1221_v59  ;;  %1722 = vrcp.f32 %v1152_v60 }
 0xdf7   : > { %1387 = vmatpush.msrb.mxu2 %v1596_v49 }
 0xdf9   : > { %1388 = vmatpush.msrb.mxu2 %v1595_v50 }
 0xdfc   : > { %v1723_v61 = vpop.eup %1722 }
 0xdfd   : > { %v1154_v62 = vmul.f32 %v1723_v61, %v1717_v51  ;;  %v1594_v51 = vld [vmem:[%s2325_s8 + $0x40] sm:$0xff] }
 0xdfe   : > { %1389 = vmatpush.msrb.mxu2 %v1594_v51 }
 0xe08   : > { %v1156_v0 = vpop.permute.xlu0 %1155 }
 0xe09   : > { %1176 = vmatpush.msrb.mxu0 %v1156_v0  ;;  %v1678_v0 = vld [vmem:[%s2326_s9 + $0x9] ss:$0 sm:$0xff] }
 0xe0a   : > { %1579 = vmatmul.msk.f32.vlgmr.msrb.gmra.mxu0 %vm501_vm5, %v1154_v62 }
 0xe0b   : > { %1344 = vmatpush.msra.mxu0 %v1591_v25 }
 0xe16   : > { %v1111_v1 = vpop.f32.mrf.mxu1 }
 0xe17   : > { %1249 = vrot.lane.b32.xlu0 %v1111_v1, %s2366_s19 }
 0xe73   : > { %v1245_v2 = vpop.f32.mrf.mxu1 }
 0xe74   : > { %1257 = vrot.lane.b32.xlu2 %v1245_v2, %s2367_s17  ;;  %s1750_s17 = scalar_lea.hbm %s2329_s12, 16 }
 0xe87   : > { %v1178_v3 = vpop.f32.mrf.mxu0 }
 0xe88   : > { %1253 = vrot.lane.b32.xlu1 %v1178_v3, %s2368_s0  ;;  %s1464_s0 = scalar_lea.hbm %s2329_s12, %s1605_s28 }
 0xe89   : > { %v1250_v9 = vpop.permute.xlu0 %1249  ;;  %s1468_s18 = sshll.u32 %s1464_s0, 4  ;;  %s1469_s18 = int_to_ptr.hbm [resolvable:$true] %s1468_s18 }
 0xe8a   : > { %v1260_v10 = vsel %vm501_vm5, %v2163_v30, %v1250_v9  ;;  %s1744_s3 = sshra.s32 %s1469_s18, 4  ;;  %s1745_s3 = int_to_ptr.hbm [resolvable:$true] %s1744_s3 }
 0xe8b   : > { %s1746_s25 = scalar_lea.hbm %s1745_s3, 8  ;;  %p1751_p0 = scmp.lt.s32.totalorder %s1745_s3, %s2329_s12 }
 0xe8c   : > { %p1747_p11 = scmp.ne.s32.totalorder %s1745_s3, %s1746_s25  ;;  %p1752_p1 = scmp.lt.s32.totalorder %s1750_s17, %s1746_s25 }
 0xe8e   : > { %p1748_p12 = pnand %p1747_p11, %p1912_p5  ;;  %p1753_p2 = por %p1752_p1, %p1751_p0 }
 0xe90   : > { %p1749_p13 = pneg %p1748_p12 }
 0xe92   : > { %p1754_p3 = pnand %p1753_p2, %p1749_p13 }
 0xece   : > { %v1258_v12 = vpop.permute.xlu2 %1257 }
 0xefa   : > { %v1254_v11 = vpop.permute.xlu1 %1253 }
 0xefb   : > { %v1261_v13 = vsel %vm782_vm6, %v1260_v10, %v1254_v11  ;;  %v1424_v11 = vld [vmem:[%s2327_s10 + $0x18] sm:$0xff] }
 0xefc   : > { %v1262_v14 = vsel %vm784_vm7, %v1261_v13, %v1258_v12  ;;  %1444 = vmatpush.msra.mxu1 %v1424_v11  ;;  %v1423_v12 = vld [vmem:[%s2327_s10 + $0x10] sm:$0xff]  ;;  %v1422_v13 = vld [vmem:[%s2327_s10 + $0x8] sm:$0xff] }
 0xefd   : > { %1587 = vmatmul.msk.f32.vlgmr.msra.gmra.mxu3 %vm427_vm0, %v1262_v14  ;;  %v1421_v14 = vld [vmem:[%s2327_s10] sm:$0xff] }
 0xefe   : > { %1445 = vmatpush.msra.mxu1 %v1423_v12 }
 0xf00   : > { %1446 = vmatpush.msra.mxu1 %v1422_v13 }
 0xf02   : > { %1447 = vmatpush.msra.mxu1 %v1421_v14 }
 0xf80   : > { %v1289_v16 = vpop.f32.mrf.mxu3 }
 0xf81   : > { %v1290_v17 = vadd.f32 %v1674_v15, %v1289_v16 }
 0xf83   : > { %v1292_v18 = vadd.f32 %v1290_v17, %v2123_v63  ;;  %v1590_v63 = vld [vmem:[%s2323_s6 + $0x30] sm:$0xff] }
 0xf84   : > { %1345 = vmatpush.msra.mxu0 %v1590_v63 }
 0xf85   : > { %v1293_v19 = vsel %vm427_vm0, %v1292_v18, 0.0 }
 0xf86   : > { %1294 = vadd.xlane.f32.xlu0 %v1293_v19  ;;  %1346 = vmatpush.msra.mxu0 %v1589_v26 }
 0xf88   : > { %1347 = vmatpush.msra.mxu0 %v1588_v27 }
 0xff9   : > { %v1295_v20 = vpop.xlane.xlu0 %1294 }
 0xffa   : > { %v1296_v21 = vmul.f32 %v1295_v20, %v1935_v8 }
 0xffc   : > { %v1297_v22 = vsub.f32 %v1292_v18, %v1296_v21 }
 0xffe   : > { %v1298_v23 = vmul.f32 %v1297_v22, %v1297_v22 }
0x1000   : > { %v1299_v24 = vsel %vm427_vm0, %v1298_v23, 0.0 }
0x1001   : > { %1300 = vadd.xlane.f32.xlu1 %v1299_v24  ;;  %v1679_v24 = vld [vmem:[%s2326_s9 + $0xc] ss:$0 sm:$0xff] }
0x1074   : > { %v1301_v28 = vpop.xlane.xlu1 %1300 }
0x1075   : > { %v1302_v29 = vmul.f32 %v1301_v28, %v1935_v8  ;;  %v1681_v28 = vld [vmem:[%s2328_s11] ss:$0 sm:$0xff] }
0x1077   : > { %v1303_v30 = vadd.f32 1e-12, %v1302_v29 }
0x1079   : > { %1724 = vrsqrt.f32 %v1303_v30  ;;  %vm1310_vm1 = vweird.f32 %v1303_v30 }
0x107f   : > { %v1725_v31 = vpop.eup %1724 }
0x1080   : > { %v1305_v33 = vmul.f32 %v1725_v31, %v1303_v30  ;;  %vm1311_vm15 = vweird.f32 %v1725_v31 }
0x1081   : > { %vm1312_vm2 = vmor %vm1310_vm1, %vm1311_vm15 }
0x1082   : > { %v1306_v34 = vmul.f32 %v1725_v31, %v1305_v33 }
0x1084   : > { %v1307_v36 = vmul.f32 0.5, %v1306_v34 }
0x1086   : > { %v1308_v35 = vsub.f32 1.5, %v1307_v36 }
0x1088   : > { %v1309_v37 = vmul.f32 %v1725_v31, %v1308_v35 }
0x108a   : > { %v1313_v39 = vsel %vm1312_vm2, %v1725_v31, %v1309_v37 }
0x108b   : > { %v1314_v40 = vmul.f32 %v1313_v39, %v1297_v22 }
0x108d   : > { %v1316_v42 = vmul.f32 %v1675_v38, %v1314_v40 }
0x108f   : > { %v1318_v44 = vadd.f32 %v1676_v41, %v1316_v42 }
0x1091   : > { %1593 = vmatmul.msk.f32.vlgmr.msra.gmra.mxu0 %vm427_vm0, %v1318_v44 }
0x110e   : > { %v1349_v53 = vpop.f32.mrf.mxu0 }
0x110f   : > { %v1350_v54 = vadd.f32 %v1677_v52, %v1349_v53 }
0x1111   : > { %v1353_v55 = vmul.f32 0.044715, %v1350_v54  ;;  %v1352_v60 = vmul.f32 0.5, %v1350_v54 }
0x1113   : > { %v1354_v56 = vmul.f32 %v1353_v55, %v1350_v54 }
0x1115   : > { %v1355_v57 = vmul.f32 %v1354_v56, %v1350_v54 }
0x1117   : > { %v1356_v58 = vadd.f32 %v1355_v57, %v1350_v54 }
0x1119   : > { %v1357_v59 = vmul.f32 0.7978846, %v1356_v58 }
0x111b   : > { %1726 = vtanh.f32 %v1357_v59 }
0x1121   : > { %v1727_v32 = vpop.eup %1726 }
0x1122   : > { %v1359_v61 = vadd.f32 1.0, %v1727_v32 }
0x1124   : > { %v1360_v62 = vmul.f32 %v1359_v61, %v1352_v60 }
0x1126   : > { %1602 = vmatmul.msk.f32.vlgmr.msrb.gmra.mxu2 %vm890_vm11, %v1360_v62 }
0x11a9   : > { %v1391_v1 = vpop.f32.mrf.mxu2 }
0x11aa   : > { %v1392_v2 = vadd.f32 %v1678_v0, %v1391_v1 }
0x11ac   : > { %v1394_v3 = vadd.f32 %v1392_v2, %v1318_v44 }
0x11ae   : > { %v1395_v4 = vsel %vm427_vm0, %v1394_v3, 0.0 }
0x11af   : > { %1396 = vadd.xlane.f32.xlu2 %v1395_v4 }
0x1222   : > { %v1397_v5 = vpop.xlane.xlu2 %1396 }
0x1223   : > { %v1398_v6 = vmul.f32 %v1397_v5, %v1935_v8 }
0x1225   : > { %v1399_v7 = vsub.f32 %v1394_v3, %v1398_v6 }
0x1227   : > { %v1400_v9 = vmul.f32 %v1399_v7, %v1399_v7 }
0x1229   : > { %v1401_v10 = vsel %vm427_vm0, %v1400_v9, 0.0 }
0x122a   : > { %1402 = vadd.xlane.f32.xlu0 %v1401_v10 }
0x129d   : > { %v1403_v15 = vpop.xlane.xlu0 %1402 }
0x129e   : > { %v1404_v16 = vmul.f32 %v1403_v15, %v1935_v8  ;;  %v1680_v8 = vld [vmem:[%s2326_s9 + $0xd] ss:$0 sm:$0xff] }
0x12a0   : > { %v1405_v17 = vadd.f32 1e-12, %v1404_v16 }
0x12a2   : > { %1728 = vrsqrt.f32 %v1405_v17  ;;  %vm1412_vm4 = vweird.f32 %v1405_v17 }
0x12a8   : > { %v1729_v18 = vpop.eup %1728 }
0x12a9   : > { %v1407_v19 = vmul.f32 %v1729_v18, %v1405_v17  ;;  %vm1413_vm3 = vweird.f32 %v1729_v18 }
0x12aa   : > { %vm1414_vm5 = vmor %vm1412_vm4, %vm1413_vm3 }
0x12ab   : > { %v1408_v20 = vmul.f32 %v1729_v18, %v1407_v19 }
0x12ad   : > { %v1409_v21 = vmul.f32 0.5, %v1408_v20 }
0x12af   : > { %v1410_v22 = vsub.f32 1.5, %v1409_v21 }
0x12b1   : > { %v1411_v23 = vmul.f32 %v1729_v18, %v1410_v22 }
0x12b3   : > { %v1415_v25 = vsel %vm1414_vm5, %v1729_v18, %v1411_v23 }
0x12b4   : > { %v1416_v63 = vmul.f32 %v1415_v25, %v1399_v7 }
0x12b6   : > { %v1418_v26 = vmul.f32 %v1679_v24, %v1416_v63 }
0x12b8   : > { %v1420_v27 = vadd.f32 %v1680_v8, %v1418_v26 }
0x12ba   : > { %1603 = vmatmul.msk.f32.vlgmr.msra.gmra.mxu1 %vm427_vm0, %v1420_v27 }
0x1337   : > { %v1449_v29 = vpop.f32.mrf.mxu1 }
0x1338   : > { %v1450_v30 = vadd.f32 %v1681_v28, %v1449_v29 }
0x133a   : > { %1452 = vst [vmem:[%s415_s1] sm:$0xff] %v1450_v30 }
0x133b   : > { %1757 = shalt.err (!%p1754_p3)
}
0x133c   : > { %1608 = dma.vmem_to_hbm [thread:$0]  (%p1912_p5), %s1467_s2, 128, %s1469_s18, %s1454_s20  }
0x133d PF: > { %p1614_p4 = scmp.ge.s32.totalorder %s1792_s24, 2  ;;  %s1480_s1 = sand.u32 1, %s1780_s21  }
0x133e   : > { %s1481_s29 = scalar_lea.sflag [#allocation3], %s1480_s1 }
0x133f   : > { %p1611_p7 = pnand %p1614_p4, %p1916_p6 }
0x1341   : > { %p1612_p8 = pneg %p1611_p7 }
0x1343   : > { %1775 = dma.done.wait (%p1612_p8), %s1481_s29, 128  }
0x1344   : > { %1777 = vsyncadd (%p1612_p8), %s1481_s29, 4294967168  ;;  %p22_p9 = scmp.ge.s32.totalorder %s1899_s27, 4   ;;  %s2369_s21 = smov %s1784_s22 }
0x1345   : > { %s2370_s22 = smov %s1788_s23  ;;  %s2371_s23 = smov %s1910_s30 }
0x1346   : > { %s2372_s24 = smov %s1899_s27  ;;  %24 = sbr.rel (!%p22_p9) target bundleno = 8 (0x8), region = 113 }
0x134b   :  { %1487 = vsyncpa [#allocation3], 1 }
0x134c   :  { %1489 = vsyncpa [#allocation3 + $0x1], 1 }

</bundles_post_ra>
